<compile_context>
chip_gen: v7x
topology: tpu7x:2x2x1
jax: 0.10.0
libtpu: 0.0.40
codegen_flags: <defaults>
</compile_context>

<pallas_src>
import functools

import jax
import jax.numpy as jnp
from jax.experimental import pallas as pl
from jax.experimental.pallas import tpu as pltpu


def _round_up(x, m):
    return (x + m - 1) // m * m


def _gelu(x):
    # TODO(synk): torch.nn.GELU default is exact (erf); tanh approximation used
    # here for robust TPU elementwise lowering (EUP tanh slot).
    c = jnp.float32(0.7978845608028654)  # sqrt(2/pi)
    return 0.5 * x * (1.0 + jnp.tanh(c * (x + 0.044715 * x * x * x)))


# ----------------------------- fused kernel ---------------------------------
def _fused_transformer_kernel(
    x_ref,
    ln1_g_ref, ln1_b_ref,
    wqkv_ref, bqkv_ref,
    wo_ref, bo_ref,
    ln2_g_ref, ln2_b_ref,
    w1_ref, b1_ref,
    w2_ref, b2_ref,
    o_ref,
    x_acc,
    *, heads, c_real, d_real, batch_tile, seq,
):
    layer = pl.program_id(1)

    # Load the activation tile from HBM only once per batch tile (layer 0);
    # it is carried across the layer axis in VMEM scratch.
    @pl.when(layer == 0)
    def _():
        x_acc[...] = x_ref[...].astype(jnp.float32)

    x = x_acc[...]                       # (BS, Cp) f32, padded lanes are zero
    BS, Cp = x.shape
    Dp = Cp // heads

    # channel mask for LayerNorm statistics over the *real* C channels only
    lane = jax.lax.broadcasted_iota(jnp.int32, (1, Cp), 1)
    cmask = (lane < c_real).astype(jnp.float32)
    inv_c = jnp.float32(1.0 / c_real)

    def layernorm(z, g, b):
        mean = jnp.sum(z, axis=-1, keepdims=True) * inv_c
        d = (z - mean) * cmask
        var = jnp.sum(d * d, axis=-1, keepdims=True) * inv_c
        # padded lanes: d == 0 and g == b == 0 -> stay exactly zero
        return d * jax.lax.rsqrt(var + 1e-5) * g + b

    # ---- attention branch: x = x + Wo(softmax(q k^T / sqrt(D)) v) + bo ----
    xq = layernorm(x, ln1_g_ref[0], ln1_b_ref[0])
    qkv = jnp.dot(xq, wqkv_ref[0], preferred_element_type=jnp.float32) + bqkv_ref[0]

    scale = jnp.float32(1.0 / float(d_real) ** 0.5)
    q = qkv[:, 0 * Cp:1 * Cp] * scale          # scale folded into q (S*D mults)
    k = qkv[:, 1 * Cp:2 * Cp]
    v = qkv[:, 2 * Cp:3 * Cp]
    wo = wo_ref[0]

    attn = jnp.zeros((BS, Cp), jnp.float32)
    for h in range(heads):                     # small static unroll, no concat
        c0 = h * Dp
        qh = q[:, c0:c0 + Dp].reshape(batch_tile, seq, Dp)
        kh = k[:, c0:c0 + Dp].reshape(batch_tile, seq, Dp)
        vh = v[:, c0:c0 + Dp].reshape(batch_tile, seq, Dp)
        s = jnp.einsum('bqd,bkd->bqk', qh, kh,
                       preferred_element_type=jnp.float32)
        s = s - jnp.max(s, axis=-1, keepdims=True)
        p = jnp.exp(s)
        p = p * pl.reciprocal(jnp.sum(p, axis=-1, keepdims=True), approx=True)
        oh = jnp.einsum('bqk,bkd->bqd', p, vh,
                        preferred_element_type=jnp.float32)
        # fold output projection into the per-head accumulation
        attn = attn + jnp.dot(oh.reshape(BS, Dp), wo[c0:c0 + Dp, :],
                              preferred_element_type=jnp.float32)

    x = x + attn + bo_ref[0]                   # content_dropout: identity (eval)

    # ---- projection residual: x = x + W2(gelu(W1(LN(x)) + b1)) + b2 ----
    h1 = layernorm(x, ln2_g_ref[0], ln2_b_ref[0])
    h2 = _gelu(jnp.dot(h1, w1_ref[0], preferred_element_type=jnp.float32)
               + b1_ref[0])
    x = x + jnp.dot(h2, w2_ref[0], preferred_element_type=jnp.float32) + b2_ref[0]
    # residual_dropout: identity (eval)

    x_acc[...] = x
    o_ref[0] = x.astype(o_ref.dtype)           # lane-dense full-tile store


# --------------------------- parameter padding -------------------------------
def _pad_and_stack_params(params, heads):
    """Zero-pad every per-layer weight to lane-dense (multiple-of-128) channel
    dims, preserving the per-head layout, and stack along a leading layer axis."""
    C = params[0]['wo'].shape[0]
    R = params[0]['w1'].shape[1]
    H = heads
    D = C // H
    Cp = _round_up(C, 128)
    assert Cp % H == 0, "padded channel dim must be divisible by heads"
    Dp = Cp // H
    Rp = _round_up(R, 128)

    def pad_vec(v, n):
        return jnp.zeros((1, n), v.dtype).at[:, :v.shape[1]].set(v)

    def pad_qkv_w(w):
        out = jnp.zeros((Cp, 3 * Cp), w.dtype)
        for s in range(3):
            for h in range(H):
                out = out.at[:C, s * Cp + h * Dp: s * Cp + h * Dp + D].set(
                    w[:, s * C + h * D: s * C + h * D + D])
        return out

    def pad_qkv_b(b):
        out = jnp.zeros((1, 3 * Cp), b.dtype)
        for s in range(3):
            for h in range(H):
                out = out.at[:, s * Cp + h * Dp: s * Cp + h * Dp + D].set(
                    b[:, s * C + h * D: s * C + h * D + D])
        return out

    def pad_wo(w):
        out = jnp.zeros((Cp, Cp), w.dtype)
        for h in range(H):
            out = out.at[h * Dp:h * Dp + D, :C].set(w[h * D:(h + 1) * D, :])
        return out

    def pad_mat(w, m, n):
        return jnp.zeros((m, n), w.dtype).at[:w.shape[0], :w.shape[1]].set(w)

    stacked = {
        'ln1_g': jnp.stack([pad_vec(p['ln1_g'], Cp) for p in params]),
        'ln1_b': jnp.stack([pad_vec(p['ln1_b'], Cp) for p in params]),
        'wqkv':  jnp.stack([pad_qkv_w(p['wqkv']) for p in params]),
        'bqkv':  jnp.stack([pad_qkv_b(p['bqkv']) for p in params]),
        'wo':    jnp.stack([pad_wo(p['wo']) for p in params]),
        'bo':    jnp.stack([pad_vec(p['bo'], Cp) for p in params]),
        'ln2_g': jnp.stack([pad_vec(p['ln2_g'], Cp) for p in params]),
        'ln2_b': jnp.stack([pad_vec(p['ln2_b'], Cp) for p in params]),
        'w1':    jnp.stack([pad_mat(p['w1'], Cp, Rp) for p in params]),
        'b1':    jnp.stack([pad_vec(p['b1'], Rp) for p in params]),
        'w2':    jnp.stack([pad_mat(p['w2'], Rp, Cp) for p in params]),
        'b2':    jnp.stack([pad_vec(p['b2'], Cp) for p in params]),
    }
    return stacked, C, D, Cp, Rp


def _choose_batch_tile(B, S):
    for bt in range(1, B + 1):
        if B % bt == 0 and (bt * S) % 8 == 0:
            return bt
    return B   # block rows == full array dim (always legal)


# ------------------------------- forward -------------------------------------
def transformer_forward(x, params, *, heads, output_layers=None):
    """Mirrors Transformer.forward: returns dict {layer_idx: activation, -1: final}."""
    if output_layers is None:
        output_layers = set()
    B, S, C = x.shape
    L = len(params)

    stacked, C_real, D_real, Cp, Rp = _pad_and_stack_params(params, heads)
    bt = _choose_batch_tile(B, S)
    n_bt = B // bt
    rows = bt * S

    x_pad = jnp.zeros((B * S, Cp), x.dtype).at[:, :C].set(x.reshape(B * S, C))

    kernel = functools.partial(
        _fused_transformer_kernel,
        heads=heads, c_real=C_real, d_real=D_real, batch_tile=bt, seq=S)

    def w_spec(arr):
        return pl.BlockSpec((1,) + arr.shape[1:], lambda b, l: (l, 0, 0))

    grid_spec = pltpu.PrefetchScalarGridSpec(
        num_scalar_prefetch=0,
        grid=(n_bt, L),                       # (parallel batch tiles, layers)
        in_specs=[
            pl.BlockSpec((rows, Cp), lambda b, l: (b, 0)),     # activation
            w_spec(stacked['ln1_g']), w_spec(stacked['ln1_b']),
            w_spec(stacked['wqkv']),  w_spec(stacked['bqkv']),
            w_spec(stacked['wo']),    w_spec(stacked['bo']),
            w_spec(stacked['ln2_g']), w_spec(stacked['ln2_b']),
            w_spec(stacked['w1']),    w_spec(stacked['b1']),
            w_spec(stacked['w2']),    w_spec(stacked['b2']),
        ],
        out_specs=pl.BlockSpec((1, rows, Cp), lambda b, l: (l, b, 0)),
        scratch_shapes=[pltpu.VMEM((rows, Cp), jnp.float32)],
    )

    out_all = pl.pallas_call(
        kernel,
        out_shape=jax.ShapeDtypeStruct((L, B * S, Cp), x.dtype),
        grid_spec=grid_spec,
        compiler_params=pltpu.CompilerParams(
            dimension_semantics=("parallel", "arbitrary"),
            vmem_limit_bytes=64 * 1024 * 1024),
    )(x_pad,
      stacked['ln1_g'], stacked['ln1_b'],
      stacked['wqkv'], stacked['bqkv'],
      stacked['wo'], stacked['bo'],
      stacked['ln2_g'], stacked['ln2_b'],
      stacked['w1'], stacked['b1'],
      stacked['w2'], stacked['b2'])

    x_out = {}
    for i in output_layers:
        x_out[i] = out_all[i, :, :C].reshape(B, S, C)
    x_out[-1] = out_all[L - 1, :, :C].reshape(B, S, C)
    return x_out


# ---------------- pure-JAX reference (for correctness check) ----------------
def _ref_block(x, p, heads):
    B, S, C = x.shape
    D = C // heads

    def ln(z, g, b):
        m = jnp.mean(z, -1, keepdims=True)
        v = jnp.mean((z - m) ** 2, -1, keepdims=True)
        return (z - m) / jnp.sqrt(v + 1e-5) * g + b

    xq = ln(x, p['ln1_g'], p['ln1_b'])
    qkv = xq @ p['wqkv'] + p['bqkv']
    q, k, v = qkv[..., :C], qkv[..., C:2 * C], qkv[..., 2 * C:]
    q = q.reshape(B, S, heads, D).transpose(0, 2, 1, 3)
    k = k.reshape(B, S, heads, D).transpose(0, 2, 1, 3)
    v = v.reshape(B, S, heads, D).transpose(0, 2, 1, 3)
    s = jnp.einsum('bhqd,bhkd->bhqk', q, k) / jnp.sqrt(jnp.float32(D))
    p_attn = jax.nn.softmax(s, axis=-1)
    o = jnp.einsum('bhqk,bhkd->bhqd', p_attn, v).transpose(0, 2, 1, 3).reshape(B, S, C)
    x = x + (o @ p['wo'] + p['bo'])
    h = ln(x, p['ln2_g'], p['ln2_b'])
    c = jnp.float32(0.7978845608028654)
    g = lambda z: 0.5 * z * (1.0 + jnp.tanh(c * (z + 0.044715 * z ** 3)))
    h = g(h @ p['w1'] + p['b1']) @ p['w2'] + p['b2']
    return x + h


def _ref_forward(x, params, heads):
    for p in params:
        x = _ref_block(x, p, heads)
    return x


# ------------------------------ parameter init ------------------------------
def init_params(key, n_blocks, channels, residual_channels):
    params = []
    for i in range(n_blocks):
        k = jax.random.fold_in(key, i)
        ks = jax.random.split(k, 4)
        std = 0.02
        p = dict(
            ln1_g=jnp.ones((1, channels), jnp.float32),
            ln1_b=jnp.zeros((1, channels), jnp.float32),
            wqkv=std * jax.random.normal(ks[0], (channels, 3 * channels), jnp.float32),
            bqkv=jnp.zeros((1, 3 * channels), jnp.float32),
            wo=std * jax.random.normal(ks[1], (channels, channels), jnp.float32),
            bo=jnp.zeros((1, channels), jnp.float32),
            ln2_g=jnp.ones((1, channels), jnp.float32),
            ln2_b=jnp.zeros((1, channels), jnp.float32),
            w1=std * jax.random.normal(ks[2], (channels, residual_channels), jnp.float32),
            b1=jnp.zeros((1, residual_channels), jnp.float32),
            w2=std * jax.random.normal(ks[3], (residual_channels, channels), jnp.float32),
            b2=jnp.zeros((1, channels), jnp.float32),
        )
        params.append(p)
    return params


if __name__ == "__main__":
    # Small config: blocks=2, channels=32, heads=4, residual_channels=128
    batch, seq, channels, heads, blocks = 2, 8, 32, 4, 2
    residual_channels = 4 * channels

    key = jax.random.PRNGKey(0)
    kx, kp = jax.random.split(key)
    x = jax.random.normal(kx, (batch, seq, channels), jnp.float32)
    params = init_params(kp, blocks, channels, residual_channels)

    out = transformer_forward(x, params, heads=heads, output_layers={0})
    final = jax.block_until_ready(out[-1])

    ref = _ref_forward(x, params, heads)
    assert final.shape == (batch, seq, channels)
    assert out[0].shape == (batch, seq, channels)
    # tolerance accounts for the approx-reciprocal softmax denominator
    assert jnp.allclose(final, ref, atol=2e-3, rtol=2e-3), "mismatch vs reference"

    print("KERNEL_OK")
</pallas_src>

<mosaic_0001>
module attributes {stable_mosaic.version = 11 : i64} {
  func.func @_fused_transformer_kernel(%arg0: i32, %arg1: i32, %arg2: memref<8x128xf32, #tpu.memory_space<vmem>>, %arg3: memref<1x1x128xf32, #tpu.memory_space<vmem>>, %arg4: memref<1x1x128xf32, #tpu.memory_space<vmem>>, %arg5: memref<1x128x384xf32, #tpu.memory_space<vmem>>, %arg6: memref<1x1x384xf32, #tpu.memory_space<vmem>>, %arg7: memref<1x128x128xf32, #tpu.memory_space<vmem>>, %arg8: memref<1x1x128xf32, #tpu.memory_space<vmem>>, %arg9: memref<1x1x128xf32, #tpu.memory_space<vmem>>, %arg10: memref<1x1x128xf32, #tpu.memory_space<vmem>>, %arg11: memref<1x128x128xf32, #tpu.memory_space<vmem>>, %arg12: memref<1x1x128xf32, #tpu.memory_space<vmem>>, %arg13: memref<1x128x128xf32, #tpu.memory_space<vmem>>, %arg14: memref<1x1x128xf32, #tpu.memory_space<vmem>>, %arg15: memref<1x8x128xf32, #tpu.memory_space<vmem>>, %arg16: memref<8x128xf32, #tpu.memory_space<vmem>>) attributes {dimension_semantics = [#tpu.dimension_semantics<parallel>, #tpu.dimension_semantics<arbitrary>], iteration_bounds = array<i64: 2, 2>, scalar_prefetch = 0 : i64, scratch_operands = 1 : i64, tpu.core_type = #tpu.core_type<tc>, window_params = [{transform_indices = @transform_0, window_bounds = array<i64: 8, 128>}, {transform_indices = @transform_1, window_bounds = array<i64: 1, 1, 128>}, {transform_indices = @transform_2, window_bounds = array<i64: 1, 1, 128>}, {transform_indices = @transform_3, window_bounds = array<i64: 1, 128, 384>}, {transform_indices = @transform_4, window_bounds = array<i64: 1, 1, 384>}, {transform_indices = @transform_5, window_bounds = array<i64: 1, 128, 128>}, {transform_indices = @transform_6, window_bounds = array<i64: 1, 1, 128>}, {transform_indices = @transform_7, window_bounds = array<i64: 1, 1, 128>}, {transform_indices = @transform_8, window_bounds = array<i64: 1, 1, 128>}, {transform_indices = @transform_9, window_bounds = array<i64: 1, 128, 128>}, {transform_indices = @transform_10, window_bounds = array<i64: 1, 1, 128>}, {transform_indices = @transform_11, window_bounds = array<i64: 1, 128, 128>}, {transform_indices = @transform_12, window_bounds = array<i64: 1, 1, 128>}, {transform_indices = @transform_13, window_bounds = array<i64: 1, 8, 128>}]} {
    %c0_i32 = arith.constant 0 : i32
    %0 = arith.cmpi eq, %arg1, %c0_i32 : i32
    %1 = arith.extui %0 : i1 to i32
    %c0_i32_0 = arith.constant 0 : i32
    %2 = arith.cmpi ne, %1, %c0_i32_0 : i32
    scf.if %2 {
      %c0_81 = arith.constant 0 : index
      %c0_82 = arith.constant 0 : index
      %201 = vector.load %arg2[%c0_81, %c0_82] : memref<8x128xf32, #tpu.memory_space<vmem>>, vector<8x128xf32>
      %c0_83 = arith.constant 0 : index
      %c0_84 = arith.constant 0 : index
      %202 = vector.load %arg16[%c0_83, %c0_84] : memref<8x128xf32, #tpu.memory_space<vmem>>, vector<8x128xf32>
      tpu.vector_store %arg16[%c0_83, %c0_84], %201 {strides = array<i32>} : memref<8x128xf32, #tpu.memory_space<vmem>>, vector<8x128xf32>,
    } else {
    }
    %c0 = arith.constant 0 : index
    %c0_1 = arith.constant 0 : index
    %3 = vector.load %arg16[%c0, %c0_1] : memref<8x128xf32, #tpu.memory_space<vmem>>, vector<8x128xf32>
    %4 = tpu.iota {dimensions = array<i32: 1>} : vector<1x128xi32>
    %c32_i32 = arith.constant 32 : i32
    %5 = vector.broadcast %c32_i32 : i32 to vector<1x128xi32>
    %6 = arith.cmpi slt, %4, %5 : vector<1x128xi32>
    %7 = arith.extui %6 : vector<1x128xi1> to vector<1x128xi32>
    %8 = arith.sitofp %7 : vector<1x128xi32> to vector<1x128xf32>
    %c0_2 = arith.constant 0 : index
    %c0_3 = arith.constant 0 : index
    %c0_4 = arith.constant 0 : index
    %9 = vector.load %arg3[%c0_2, %c0_3, %c0_4] : memref<1x1x128xf32, #tpu.memory_space<vmem>>, vector<1x1x128xf32>
    %10 = vector.shape_cast %9 : vector<1x1x128xf32> to vector<1x128xf32>
    %c0_5 = arith.constant 0 : index
    %c0_6 = arith.constant 0 : index
    %c0_7 = arith.constant 0 : index
    %11 = vector.load %arg4[%c0_5, %c0_6, %c0_7] : memref<1x1x128xf32, #tpu.memory_space<vmem>>, vector<1x1x128xf32>
    %12 = vector.shape_cast %11 : vector<1x1x128xf32> to vector<1x128xf32>
    %cst = arith.constant dense<0.000000e+00> : vector<8xf32>
    %13 = vector.multi_reduction <add>, %3, %cst [1] : vector<8x128xf32> to vector<8xf32>
    %14 = vector.shape_cast %13 : vector<8xf32> to vector<8x1xf32>
    %cst_8 = arith.constant 3.125000e-02 : f32
    %15 = vector.broadcast %cst_8 : f32 to vector<8x1xf32>
    %16 = arith.mulf %14, %15 : vector<8x1xf32>
    %17 = vector.broadcast %16 : vector<8x1xf32> to vector<8x128xf32>
    %18 = arith.subf %3, %17 : vector<8x128xf32>
    %19 = vector.broadcast %8 : vector<1x128xf32> to vector<8x128xf32>
    %20 = arith.mulf %18, %19 : vector<8x128xf32>
    %21 = arith.mulf %20, %20 : vector<8x128xf32>
    %cst_9 = arith.constant dense<0.000000e+00> : vector<8xf32>
    %22 = vector.multi_reduction <add>, %21, %cst_9 [1] : vector<8x128xf32> to vector<8xf32>
    %23 = vector.shape_cast %22 : vector<8xf32> to vector<8x1xf32>
    %cst_10 = arith.constant 3.125000e-02 : f32
    %24 = vector.broadcast %cst_10 : f32 to vector<8x1xf32>
    %25 = arith.mulf %23, %24 : vector<8x1xf32>
    %cst_11 = arith.constant 9.99999974E-6 : f32
    %26 = vector.broadcast %cst_11 : f32 to vector<8x1xf32>
    %27 = arith.addf %25, %26 : vector<8x1xf32>
    %28 = math.rsqrt %27 : vector<8x1xf32>
    %29 = vector.broadcast %28 : vector<8x1xf32> to vector<8x128xf32>
    %30 = arith.mulf %20, %29 : vector<8x128xf32>
    %31 = vector.broadcast %10 : vector<1x128xf32> to vector<8x128xf32>
    %32 = arith.mulf %30, %31 : vector<8x128xf32>
    %33 = vector.broadcast %12 : vector<1x128xf32> to vector<8x128xf32>
    %34 = arith.addf %32, %33 : vector<8x128xf32>
    %c0_12 = arith.constant 0 : index
    %c0_13 = arith.constant 0 : index
    %c0_14 = arith.constant 0 : index
    %35 = vector.load %arg5[%c0_12, %c0_13, %c0_14] : memref<1x128x384xf32, #tpu.memory_space<vmem>>, vector<1x128x384xf32>
    %36 = vector.shape_cast %35 : vector<1x128x384xf32> to vector<128x384xf32>
    %cst_15 = arith.constant dense<0.000000e+00> : vector<8x384xf32>
    %37 = tpu.matmul %34, %36, %cst_15 {dimension_numbers = #tpu.dot_dimension_numbers<[1], [0], [0], [1], [0, 0, 1, 1], [], []>} : vector<8x128xf32>, vector<128x384xf32>, vector<8x384xf32> -> vector<8x384xf32>
    %c0_16 = arith.constant 0 : index
    %c0_17 = arith.constant 0 : index
    %c0_18 = arith.constant 0 : index
    %38 = vector.load %arg6[%c0_16, %c0_17, %c0_18] : memref<1x1x384xf32, #tpu.memory_space<vmem>>, vector<1x1x384xf32>
    %39 = vector.shape_cast %38 : vector<1x1x384xf32> to vector<1x384xf32>
    %40 = vector.broadcast %39 : vector<1x384xf32> to vector<8x384xf32>
    %41 = arith.addf %37, %40 : vector<8x384xf32>
    %42 = vector.extract_strided_slice %41 {offsets = [0, 0], sizes = [8, 128], strides = [1, 1]} : vector<8x384xf32> to vector<8x128xf32>
    %cst_19 = arith.constant 0.353553385 : f32
    %43 = vector.broadcast %cst_19 : f32 to vector<8x128xf32>
    %44 = arith.mulf %42, %43 : vector<8x128xf32>
    %45 = vector.extract_strided_slice %41 {offsets = [0, 128], sizes = [8, 128], strides = [1, 1]} : vector<8x384xf32> to vector<8x128xf32>
    %46 = vector.extract_strided_slice %41 {offsets = [0, 256], sizes = [8, 128], strides = [1, 1]} : vector<8x384xf32> to vector<8x128xf32>
    %c0_20 = arith.constant 0 : index
    %c0_21 = arith.constant 0 : index
    %c0_22 = arith.constant 0 : index
    %47 = vector.load %arg7[%c0_20, %c0_21, %c0_22] : memref<1x128x128xf32, #tpu.memory_space<vmem>>, vector<1x128x128xf32>
    %48 = vector.shape_cast %47 : vector<1x128x128xf32> to vector<128x128xf32>
    %cst_23 = arith.constant 0.000000e+00 : f32
    %49 = vector.broadcast %cst_23 : f32 to vector<8x128xf32>
    %50 = vector.extract_strided_slice %44 {offsets = [0, 0], sizes = [8, 32], strides = [1, 1]} : vector<8x128xf32> to vector<8x32xf32>
    %51 = vector.shape_cast %50 : vector<8x32xf32> to vector<1x8x32xf32>
    %52 = vector.extract_strided_slice %45 {offsets = [0, 0], sizes = [8, 32], strides = [1, 1]} : vector<8x128xf32> to vector<8x32xf32>
    %53 = vector.shape_cast %52 : vector<8x32xf32> to vector<1x8x32xf32>
    %54 = vector.extract_strided_slice %46 {offsets = [0, 0], sizes = [8, 32], strides = [1, 1]} : vector<8x128xf32> to vector<8x32xf32>
    %55 = vector.shape_cast %54 : vector<8x32xf32> to vector<1x8x32xf32>
    "tpu.trace_start"() <{level = 10 : i32, message = "bqd,bkd->bqk"}> : () -> ()
    %cst_24 = arith.constant dense<0.000000e+00> : vector<1x8x8xf32>
    %56 = tpu.matmul %51, %53, %cst_24 {dimension_numbers = #tpu.dot_dimension_numbers<[2], [2], [1], [1], [0, 0, 0, 1, 1, 1], [0], [0]>} : vector<1x8x32xf32>, vector<1x8x32xf32>, vector<1x8x8xf32> -> vector<1x8x8xf32>
    "tpu.trace_stop"() : () -> ()
    %cst_25 = arith.constant dense<0xFF800000> : vector<1x8xf32>
    %57 = vector.multi_reduction <maximumf>, %56, %cst_25 [2] : vector<1x8x8xf32> to vector<1x8xf32>
    %58 = vector.shape_cast %57 : vector<1x8xf32> to vector<1x8x1xf32>
    %59 = vector.broadcast %58 : vector<1x8x1xf32> to vector<1x8x8xf32>
    %60 = arith.subf %56, %59 : vector<1x8x8xf32>
    %61 = math.exp %60 : vector<1x8x8xf32>
    %cst_26 = arith.constant dense<0.000000e+00> : vector<1x8xf32>
    %62 = vector.multi_reduction <add>, %61, %cst_26 [2] : vector<1x8x8xf32> to vector<1x8xf32>
    %63 = vector.shape_cast %62 : vector<1x8xf32> to vector<1x8x1xf32>
    %64 = tpu.reciprocal %63 {approx = true} : vector<1x8x1xf32> -> vector<1x8x1xf32>
    %65 = vector.broadcast %64 : vector<1x8x1xf32> to vector<1x8x8xf32>
    %66 = arith.mulf %61, %65 : vector<1x8x8xf32>
    "tpu.trace_start"() <{level = 10 : i32, message = "bqk,bkd->bqd"}> : () -> ()
    %cst_27 = arith.constant dense<0.000000e+00> : vector<1x8x32xf32>
    %67 = tpu.matmul %66, %55, %cst_27 {dimension_numbers = #tpu.dot_dimension_numbers<[2], [1], [1], [2], [0, 0, 0, 1, 1, 2], [0], [0]>} : vector<1x8x8xf32>, vector<1x8x32xf32>, vector<1x8x32xf32> -> vector<1x8x32xf32>
    "tpu.trace_stop"() : () -> ()
    %68 = vector.shape_cast %67 : vector<1x8x32xf32> to vector<8x32xf32>
    %69 = vector.extract_strided_slice %48 {offsets = [0, 0], sizes = [32, 128], strides = [1, 1]} : vector<128x128xf32> to vector<32x128xf32>
    %cst_28 = arith.constant dense<0.000000e+00> : vector<8x128xf32>
    %70 = tpu.matmul %68, %69, %cst_28 {dimension_numbers = #tpu.dot_dimension_numbers<[1], [0], [0], [1], [0, 0, 1, 1], [], []>} : vector<8x32xf32>, vector<32x128xf32>, vector<8x128xf32> -> vector<8x128xf32>
    %71 = arith.addf %49, %70 : vector<8x128xf32>
    %72 = vector.extract_strided_slice %44 {offsets = [0, 32], sizes = [8, 32], strides = [1, 1]} : vector<8x128xf32> to vector<8x32xf32>
    %73 = vector.shape_cast %72 : vector<8x32xf32> to vector<1x8x32xf32>
    %74 = vector.extract_strided_slice %45 {offsets = [0, 32], sizes = [8, 32], strides = [1, 1]} : vector<8x128xf32> to vector<8x32xf32>
    %75 = vector.shape_cast %74 : vector<8x32xf32> to vector<1x8x32xf32>
    %76 = vector.extract_strided_slice %46 {offsets = [0, 32], sizes = [8, 32], strides = [1, 1]} : vector<8x128xf32> to vector<8x32xf32>
    %77 = vector.shape_cast %76 : vector<8x32xf32> to vector<1x8x32xf32>
    "tpu.trace_start"() <{level = 10 : i32, message = "bqd,bkd->bqk"}> : () -> ()
    %cst_29 = arith.constant dense<0.000000e+00> : vector<1x8x8xf32>
    %78 = tpu.matmul %73, %75, %cst_29 {dimension_numbers = #tpu.dot_dimension_numbers<[2], [2], [1], [1], [0, 0, 0, 1, 1, 1], [0], [0]>} : vector<1x8x32xf32>, vector<1x8x32xf32>, vector<1x8x8xf32> -> vector<1x8x8xf32>
    "tpu.trace_stop"() : () -> ()
    %cst_30 = arith.constant dense<0xFF800000> : vector<1x8xf32>
    %79 = vector.multi_reduction <maximumf>, %78, %cst_30 [2] : vector<1x8x8xf32> to vector<1x8xf32>
    %80 = vector.shape_cast %79 : vector<1x8xf32> to vector<1x8x1xf32>
    %81 = vector.broadcast %80 : vector<1x8x1xf32> to vector<1x8x8xf32>
    %82 = arith.subf %78, %81 : vector<1x8x8xf32>
    %83 = math.exp %82 : vector<1x8x8xf32>
    %cst_31 = arith.constant dense<0.000000e+00> : vector<1x8xf32>
    %84 = vector.multi_reduction <add>, %83, %cst_31 [2] : vector<1x8x8xf32> to vector<1x8xf32>
    %85 = vector.shape_cast %84 : vector<1x8xf32> to vector<1x8x1xf32>
    %86 = tpu.reciprocal %85 {approx = true} : vector<1x8x1xf32> -> vector<1x8x1xf32>
    %87 = vector.broadcast %86 : vector<1x8x1xf32> to vector<1x8x8xf32>
    %88 = arith.mulf %83, %87 : vector<1x8x8xf32>
    "tpu.trace_start"() <{level = 10 : i32, message = "bqk,bkd->bqd"}> : () -> ()
    %cst_32 = arith.constant dense<0.000000e+00> : vector<1x8x32xf32>
    %89 = tpu.matmul %88, %77, %cst_32 {dimension_numbers = #tpu.dot_dimension_numbers<[2], [1], [1], [2], [0, 0, 0, 1, 1, 2], [0], [0]>} : vector<1x8x8xf32>, vector<1x8x32xf32>, vector<1x8x32xf32> -> vector<1x8x32xf32>
    "tpu.trace_stop"() : () -> ()
    %90 = vector.shape_cast %89 : vector<1x8x32xf32> to vector<8x32xf32>
    %91 = vector.extract_strided_slice %48 {offsets = [32, 0], sizes = [32, 128], strides = [1, 1]} : vector<128x128xf32> to vector<32x128xf32>
    %cst_33 = arith.constant dense<0.000000e+00> : vector<8x128xf32>
    %92 = tpu.matmul %90, %91, %cst_33 {dimension_numbers = #tpu.dot_dimension_numbers<[1], [0], [0], [1], [0, 0, 1, 1], [], []>} : vector<8x32xf32>, vector<32x128xf32>, vector<8x128xf32> -> vector<8x128xf32>
    %93 = arith.addf %71, %92 : vector<8x128xf32>
    %94 = vector.extract_strided_slice %44 {offsets = [0, 64], sizes = [8, 32], strides = [1, 1]} : vector<8x128xf32> to vector<8x32xf32>
    %95 = vector.shape_cast %94 : vector<8x32xf32> to vector<1x8x32xf32>
    %96 = vector.extract_strided_slice %45 {offsets = [0, 64], sizes = [8, 32], strides = [1, 1]} : vector<8x128xf32> to vector<8x32xf32>
    %97 = vector.shape_cast %96 : vector<8x32xf32> to vector<1x8x32xf32>
    %98 = vector.extract_strided_slice %46 {offsets = [0, 64], sizes = [8, 32], strides = [1, 1]} : vector<8x128xf32> to vector<8x32xf32>
    %99 = vector.shape_cast %98 : vector<8x32xf32> to vector<1x8x32xf32>
    "tpu.trace_start"() <{level = 10 : i32, message = "bqd,bkd->bqk"}> : () -> ()
    %cst_34 = arith.constant dense<0.000000e+00> : vector<1x8x8xf32>
    %100 = tpu.matmul %95, %97, %cst_34 {dimension_numbers = #tpu.dot_dimension_numbers<[2], [2], [1], [1], [0, 0, 0, 1, 1, 1], [0], [0]>} : vector<1x8x32xf32>, vector<1x8x32xf32>, vector<1x8x8xf32> -> vector<1x8x8xf32>
    "tpu.trace_stop"() : () -> ()
    %cst_35 = arith.constant dense<0xFF800000> : vector<1x8xf32>
    %101 = vector.multi_reduction <maximumf>, %100, %cst_35 [2] : vector<1x8x8xf32> to vector<1x8xf32>
    %102 = vector.shape_cast %101 : vector<1x8xf32> to vector<1x8x1xf32>
    %103 = vector.broadcast %102 : vector<1x8x1xf32> to vector<1x8x8xf32>
    %104 = arith.subf %100, %103 : vector<1x8x8xf32>
    %105 = math.exp %104 : vector<1x8x8xf32>
    %cst_36 = arith.constant dense<0.000000e+00> : vector<1x8xf32>
    %106 = vector.multi_reduction <add>, %105, %cst_36 [2] : vector<1x8x8xf32> to vector<1x8xf32>
    %107 = vector.shape_cast %106 : vector<1x8xf32> to vector<1x8x1xf32>
    %108 = tpu.reciprocal %107 {approx = true} : vector<1x8x1xf32> -> vector<1x8x1xf32>
    %109 = vector.broadcast %108 : vector<1x8x1xf32> to vector<1x8x8xf32>
    %110 = arith.mulf %105, %109 : vector<1x8x8xf32>
    "tpu.trace_start"() <{level = 10 : i32, message = "bqk,bkd->bqd"}> : () -> ()
    %cst_37 = arith.constant dense<0.000000e+00> : vector<1x8x32xf32>
    %111 = tpu.matmul %110, %99, %cst_37 {dimension_numbers = #tpu.dot_dimension_numbers<[2], [1], [1], [2], [0, 0, 0, 1, 1, 2], [0], [0]>} : vector<1x8x8xf32>, vector<1x8x32xf32>, vector<1x8x32xf32> -> vector<1x8x32xf32>
    "tpu.trace_stop"() : () -> ()
    %112 = vector.shape_cast %111 : vector<1x8x32xf32> to vector<8x32xf32>
    %113 = vector.extract_strided_slice %48 {offsets = [64, 0], sizes = [32, 128], strides = [1, 1]} : vector<128x128xf32> to vector<32x128xf32>
    %cst_38 = arith.constant dense<0.000000e+00> : vector<8x128xf32>
    %114 = tpu.matmul %112, %113, %cst_38 {dimension_numbers = #tpu.dot_dimension_numbers<[1], [0], [0], [1], [0, 0, 1, 1], [], []>} : vector<8x32xf32>, vector<32x128xf32>, vector<8x128xf32> -> vector<8x128xf32>
    %115 = arith.addf %93, %114 : vector<8x128xf32>
    %116 = vector.extract_strided_slice %44 {offsets = [0, 96], sizes = [8, 32], strides = [1, 1]} : vector<8x128xf32> to vector<8x32xf32>
    %117 = vector.shape_cast %116 : vector<8x32xf32> to vector<1x8x32xf32>
    %118 = vector.extract_strided_slice %45 {offsets = [0, 96], sizes = [8, 32], strides = [1, 1]} : vector<8x128xf32> to vector<8x32xf32>
    %119 = vector.shape_cast %118 : vector<8x32xf32> to vector<1x8x32xf32>
    %120 = vector.extract_strided_slice %46 {offsets = [0, 96], sizes = [8, 32], strides = [1, 1]} : vector<8x128xf32> to vector<8x32xf32>
    %121 = vector.shape_cast %120 : vector<8x32xf32> to vector<1x8x32xf32>
    "tpu.trace_start"() <{level = 10 : i32, message = "bqd,bkd->bqk"}> : () -> ()
    %cst_39 = arith.constant dense<0.000000e+00> : vector<1x8x8xf32>
    %122 = tpu.matmul %117, %119, %cst_39 {dimension_numbers = #tpu.dot_dimension_numbers<[2], [2], [1], [1], [0, 0, 0, 1, 1, 1], [0], [0]>} : vector<1x8x32xf32>, vector<1x8x32xf32>, vector<1x8x8xf32> -> vector<1x8x8xf32>
    "tpu.trace_stop"() : () -> ()
    %cst_40 = arith.constant dense<0xFF800000> : vector<1x8xf32>
    %123 = vector.multi_reduction <maximumf>, %122, %cst_40 [2] : vector<1x8x8xf32> to vector<1x8xf32>
    %124 = vector.shape_cast %123 : vector<1x8xf32> to vector<1x8x1xf32>
    %125 = vector.broadcast %124 : vector<1x8x1xf32> to vector<1x8x8xf32>
    %126 = arith.subf %122, %125 : vector<1x8x8xf32>
    %127 = math.exp %126 : vector<1x8x8xf32>
    %cst_41 = arith.constant dense<0.000000e+00> : vector<1x8xf32>
    %128 = vector.multi_reduction <add>, %127, %cst_41 [2] : vector<1x8x8xf32> to vector<1x8xf32>
    %129 = vector.shape_cast %128 : vector<1x8xf32> to vector<1x8x1xf32>
    %130 = tpu.reciprocal %129 {approx = true} : vector<1x8x1xf32> -> vector<1x8x1xf32>
    %131 = vector.broadcast %130 : vector<1x8x1xf32> to vector<1x8x8xf32>
    %132 = arith.mulf %127, %131 : vector<1x8x8xf32>
    "tpu.trace_start"() <{level = 10 : i32, message = "bqk,bkd->bqd"}> : () -> ()
    %cst_42 = arith.constant dense<0.000000e+00> : vector<1x8x32xf32>
    %133 = tpu.matmul %132, %121, %cst_42 {dimension_numbers = #tpu.dot_dimension_numbers<[2], [1], [1], [2], [0, 0, 0, 1, 1, 2], [0], [0]>} : vector<1x8x8xf32>, vector<1x8x32xf32>, vector<1x8x32xf32> -> vector<1x8x32xf32>
    "tpu.trace_stop"() : () -> ()
    %134 = vector.shape_cast %133 : vector<1x8x32xf32> to vector<8x32xf32>
    %135 = vector.extract_strided_slice %48 {offsets = [96, 0], sizes = [32, 128], strides = [1, 1]} : vector<128x128xf32> to vector<32x128xf32>
    %cst_43 = arith.constant dense<0.000000e+00> : vector<8x128xf32>
    %136 = tpu.matmul %134, %135, %cst_43 {dimension_numbers = #tpu.dot_dimension_numbers<[1], [0], [0], [1], [0, 0, 1, 1], [], []>} : vector<8x32xf32>, vector<32x128xf32>, vector<8x128xf32> -> vector<8x128xf32>
    %137 = arith.addf %115, %136 : vector<8x128xf32>
    %138 = arith.addf %3, %137 : vector<8x128xf32>
    %c0_44 = arith.constant 0 : index
    %c0_45 = arith.constant 0 : index
    %c0_46 = arith.constant 0 : index
    %139 = vector.load %arg8[%c0_44, %c0_45, %c0_46] : memref<1x1x128xf32, #tpu.memory_space<vmem>>, vector<1x1x128xf32>
    %140 = vector.shape_cast %139 : vector<1x1x128xf32> to vector<1x128xf32>
    %141 = vector.broadcast %140 : vector<1x128xf32> to vector<8x128xf32>
    %142 = arith.addf %138, %141 : vector<8x128xf32>
    %c0_47 = arith.constant 0 : index
    %c0_48 = arith.constant 0 : index
    %c0_49 = arith.constant 0 : index
    %143 = vector.load %arg9[%c0_47, %c0_48, %c0_49] : memref<1x1x128xf32, #tpu.memory_space<vmem>>, vector<1x1x128xf32>
    %144 = vector.shape_cast %143 : vector<1x1x128xf32> to vector<1x128xf32>
    %c0_50 = arith.constant 0 : index
    %c0_51 = arith.constant 0 : index
    %c0_52 = arith.constant 0 : index
    %145 = vector.load %arg10[%c0_50, %c0_51, %c0_52] : memref<1x1x128xf32, #tpu.memory_space<vmem>>, vector<1x1x128xf32>
    %146 = vector.shape_cast %145 : vector<1x1x128xf32> to vector<1x128xf32>
    %cst_53 = arith.constant dense<0.000000e+00> : vector<8xf32>
    %147 = vector.multi_reduction <add>, %142, %cst_53 [1] : vector<8x128xf32> to vector<8xf32>
    %148 = vector.shape_cast %147 : vector<8xf32> to vector<8x1xf32>
    %cst_54 = arith.constant 3.125000e-02 : f32
    %149 = vector.broadcast %cst_54 : f32 to vector<8x1xf32>
    %150 = arith.mulf %148, %149 : vector<8x1xf32>
    %151 = vector.broadcast %150 : vector<8x1xf32> to vector<8x128xf32>
    %152 = arith.subf %142, %151 : vector<8x128xf32>
    %153 = vector.broadcast %8 : vector<1x128xf32> to vector<8x128xf32>
    %154 = arith.mulf %152, %153 : vector<8x128xf32>
    %155 = arith.mulf %154, %154 : vector<8x128xf32>
    %cst_55 = arith.constant dense<0.000000e+00> : vector<8xf32>
    %156 = vector.multi_reduction <add>, %155, %cst_55 [1] : vector<8x128xf32> to vector<8xf32>
    %157 = vector.shape_cast %156 : vector<8xf32> to vector<8x1xf32>
    %cst_56 = arith.constant 3.125000e-02 : f32
    %158 = vector.broadcast %cst_56 : f32 to vector<8x1xf32>
    %159 = arith.mulf %157, %158 : vector<8x1xf32>
    %cst_57 = arith.constant 9.99999974E-6 : f32
    %160 = vector.broadcast %cst_57 : f32 to vector<8x1xf32>
    %161 = arith.addf %159, %160 : vector<8x1xf32>
    %162 = math.rsqrt %161 : vector<8x1xf32>
    %163 = vector.broadcast %162 : vector<8x1xf32> to vector<8x128xf32>
    %164 = arith.mulf %154, %163 : vector<8x128xf32>
    %165 = vector.broadcast %144 : vector<1x128xf32> to vector<8x128xf32>
    %166 = arith.mulf %164, %165 : vector<8x128xf32>
    %167 = vector.broadcast %146 : vector<1x128xf32> to vector<8x128xf32>
    %168 = arith.addf %166, %167 : vector<8x128xf32>
    %c0_58 = arith.constant 0 : index
    %c0_59 = arith.constant 0 : index
    %c0_60 = arith.constant 0 : index
    %169 = vector.load %arg11[%c0_58, %c0_59, %c0_60] : memref<1x128x128xf32, #tpu.memory_space<vmem>>, vector<1x128x128xf32>
    %170 = vector.shape_cast %169 : vector<1x128x128xf32> to vector<128x128xf32>
    %cst_61 = arith.constant dense<0.000000e+00> : vector<8x128xf32>
    %171 = tpu.matmul %168, %170, %cst_61 {dimension_numbers = #tpu.dot_dimension_numbers<[1], [0], [0], [1], [0, 0, 1, 1], [], []>} : vector<8x128xf32>, vector<128x128xf32>, vector<8x128xf32> -> vector<8x128xf32>
    %c0_62 = arith.constant 0 : index
    %c0_63 = arith.constant 0 : index
    %c0_64 = arith.constant 0 : index
    %172 = vector.load %arg12[%c0_62, %c0_63, %c0_64] : memref<1x1x128xf32, #tpu.memory_space<vmem>>, vector<1x1x128xf32>
    %173 = vector.shape_cast %172 : vector<1x1x128xf32> to vector<1x128xf32>
    %174 = vector.broadcast %173 : vector<1x128xf32> to vector<8x128xf32>
    %175 = arith.addf %171, %174 : vector<8x128xf32>
    %cst_65 = arith.constant 5.000000e-01 : f32
    %176 = vector.broadcast %cst_65 : f32 to vector<8x128xf32>
    %177 = arith.mulf %176, %175 : vector<8x128xf32>
    %cst_66 = arith.constant 4.471500e-02 : f32
    %178 = vector.broadcast %cst_66 : f32 to vector<8x128xf32>
    %179 = arith.mulf %178, %175 : vector<8x128xf32>
    %180 = arith.mulf %179, %175 : vector<8x128xf32>
    %181 = arith.mulf %180, %175 : vector<8x128xf32>
    %182 = arith.addf %175, %181 : vector<8x128xf32>
    %cst_67 = arith.constant 0.797884583 : f32
    %183 = vector.broadcast %cst_67 : f32 to vector<8x128xf32>
    %184 = arith.mulf %183, %182 : vector<8x128xf32>
    %185 = math.tanh %184 : vector<8x128xf32>
    %cst_68 = arith.constant 1.000000e+00 : f32
    %186 = vector.broadcast %cst_68 : f32 to vector<8x128xf32>
    %187 = arith.addf %186, %185 : vector<8x128xf32>
    %188 = arith.mulf %177, %187 : vector<8x128xf32>
    %c0_69 = arith.constant 0 : index
    %c0_70 = arith.constant 0 : index
    %c0_71 = arith.constant 0 : index
    %189 = vector.load %arg13[%c0_69, %c0_70, %c0_71] : memref<1x128x128xf32, #tpu.memory_space<vmem>>, vector<1x128x128xf32>
    %190 = vector.shape_cast %189 : vector<1x128x128xf32> to vector<128x128xf32>
    %cst_72 = arith.constant dense<0.000000e+00> : vector<8x128xf32>
    %191 = tpu.matmul %188, %190, %cst_72 {dimension_numbers = #tpu.dot_dimension_numbers<[1], [0], [0], [1], [0, 0, 1, 1], [], []>} : vector<8x128xf32>, vector<128x128xf32>, vector<8x128xf32> -> vector<8x128xf32>
    %192 = arith.addf %142, %191 : vector<8x128xf32>
    %c0_73 = arith.constant 0 : index
    %c0_74 = arith.constant 0 : index
    %c0_75 = arith.constant 0 : index
    %193 = vector.load %arg14[%c0_73, %c0_74, %c0_75] : memref<1x1x128xf32, #tpu.memory_space<vmem>>, vector<1x1x128xf32>
    %194 = vector.shape_cast %193 : vector<1x1x128xf32> to vector<1x128xf32>
    %195 = vector.broadcast %194 : vector<1x128xf32> to vector<8x128xf32>
    %196 = arith.addf %192, %195 : vector<8x128xf32>
    %c0_76 = arith.constant 0 : index
    %c0_77 = arith.constant 0 : index
    %197 = vector.load %arg16[%c0_76, %c0_77] : memref<8x128xf32, #tpu.memory_space<vmem>>, vector<8x128xf32>
    tpu.vector_store %arg16[%c0_76, %c0_77], %196 {strides = array<i32>} : memref<8x128xf32, #tpu.memory_space<vmem>>, vector<8x128xf32>,
    %c0_78 = arith.constant 0 : index
    %c0_79 = arith.constant 0 : index
    %c0_80 = arith.constant 0 : index
    %198 = vector.load %arg15[%c0_78, %c0_79, %c0_80] : memref<1x8x128xf32, #tpu.memory_space<vmem>>, vector<1x8x128xf32>
    %199 = vector.shape_cast %198 : vector<1x8x128xf32> to vector<8x128xf32>
    %200 = vector.shape_cast %196 : vector<8x128xf32> to vector<1x8x128xf32>
    tpu.vector_store %arg15[%c0_78, %c0_79, %c0_80], %200 {strides = array<i32>} : memref<1x8x128xf32, #tpu.memory_space<vmem>>, vector<1x8x128xf32>,
    return
  }
  func.func @transform_0(%arg0: i32, %arg1: i32) -> (i32, i32) {
    %c0_i32 = arith.constant 0 : i32
    %c0_i32_0 = arith.constant 0 : i32
    return %arg0, %c0_i32 : i32, i32
  }
  func.func @transform_1(%arg0: i32, %arg1: i32) -> (i32, i32, i32) {
    %c0_i32 = arith.constant 0 : i32
    %c0_i32_0 = arith.constant 0 : i32
    %c0_i32_1 = arith.constant 0 : i32
    return %arg1, %c0_i32, %c0_i32_0 : i32, i32, i32
  }
  func.func @transform_2(%arg0: i32, %arg1: i32) -> (i32, i32, i32) {
    %c0_i32 = arith.constant 0 : i32
    %c0_i32_0 = arith.constant 0 : i32
    %c0_i32_1 = arith.constant 0 : i32
    return %arg1, %c0_i32, %c0_i32_0 : i32, i32, i32
  }
  func.func @transform_3(%arg0: i32, %arg1: i32) -> (i32, i32, i32) {
    %c0_i32 = arith.constant 0 : i32
    %c0_i32_0 = arith.constant 0 : i32
    %c0_i32_1 = arith.constant 0 : i32
    return %arg1, %c0_i32, %c0_i32_0 : i32, i32, i32
  }
  func.func @transform_4(%arg0: i32, %arg1: i32) -> (i32, i32, i32) {
    %c0_i32 = arith.constant 0 : i32
    %c0_i32_0 = arith.constant 0 : i32
    %c0_i32_1 = arith.constant 0 : i32
    return %arg1, %c0_i32, %c0_i32_0 : i32, i32, i32
  }
  func.func @transform_5(%arg0: i32, %arg1: i32) -> (i32, i32, i32) {
    %c0_i32 = arith.constant 0 : i32
    %c0_i32_0 = arith.constant 0 : i32
    %c0_i32_1 = arith.constant 0 : i32
    return %arg1, %c0_i32, %c0_i32_0 : i32, i32, i32
  }
  func.func @transform_6(%arg0: i32, %arg1: i32) -> (i32, i32, i32) {
    %c0_i32 = arith.constant 0 : i32
    %c0_i32_0 = arith.constant 0 : i32
    %c0_i32_1 = arith.constant 0 : i32
    return %arg1, %c0_i32, %c0_i32_0 : i32, i32, i32
  }
  func.func @transform_7(%arg0: i32, %arg1: i32) -> (i32, i32, i32) {
    %c0_i32 = arith.constant 0 : i32
    %c0_i32_0 = arith.constant 0 : i32
    %c0_i32_1 = arith.constant 0 : i32
    return %arg1, %c0_i32, %c0_i32_0 : i32, i32, i32
  }
  func.func @transform_8(%arg0: i32, %arg1: i32) -> (i32, i32, i32) {
    %c0_i32 = arith.constant 0 : i32
    %c0_i32_0 = arith.constant 0 : i32
    %c0_i32_1 = arith.constant 0 : i32
    return %arg1, %c0_i32, %c0_i32_0 : i32, i32, i32
  }
  func.func @transform_9(%arg0: i32, %arg1: i32) -> (i32, i32, i32) {
    %c0_i32 = arith.constant 0 : i32
    %c0_i32_0 = arith.constant 0 : i32
    %c0_i32_1 = arith.constant 0 : i32
    return %arg1, %c0_i32, %c0_i32_0 : i32, i32, i32
  }
  func.func @transform_10(%arg0: i32, %arg1: i32) -> (i32, i32, i32) {
    %c0_i32 = arith.constant 0 : i32
    %c0_i32_0 = arith.constant 0 : i32
    %c0_i32_1 = arith.constant 0 : i32
    return %arg1, %c0_i32, %c0_i32_0 : i32, i32, i32
  }
  func.func @transform_11(%arg0: i32, %arg1: i32) -> (i32, i32, i32) {
    %c0_i32 = arith.constant 0 : i32
    %c0_i32_0 = arith.constant 0 : i32
    %c0_i32_1 = arith.constant 0 : i32
    return %arg1, %c0_i32, %c0_i32_0 : i32, i32, i32
  }
  func.func @transform_12(%arg0: i32, %arg1: i32) -> (i32, i32, i32) {
    %c0_i32 = arith.constant 0 : i32
    %c0_i32_0 = arith.constant 0 : i32
    %c0_i32_1 = arith.constant 0 : i32
    return %arg1, %c0_i32, %c0_i32_0 : i32, i32, i32
  }
  func.func @transform_13(%arg0: i32, %arg1: i32) -> (i32, i32, i32) {
    %c0_i32 = arith.constant 0 : i32
    %c0_i32_0 = arith.constant 0 : i32
    return %arg1, %arg0, %c0_i32 : i32, i32, i32
  }
}

</mosaic_0001>

<bundles_post_ra>
// kernel: tpu_custom_call.1
= control target key start
LH: loop header
LB: loop body
LE: loop exit
PB: predicated region body
PF: predicated region fallthrough
CT: control target
= control target key end

     0   :  { %s5014_s0 = inlined_call_operand.hbm [shape: f32[16,128], index: 0, kind: input, shape index: {}]   ;;  %s5015_s1 = inlined_call_operand.hbm [shape: f32[2,1,128], index: 1, kind: input, shape index: {}]   ;;  %s5016_s2 = inlined_call_operand.hbm [shape: f32[2,1,128], index: 2, kind: input, shape index: {}]   ;;  %s5017_s3 = inlined_call_operand.hbm [shape: f32[2,128,384], index: 3, kind: input, shape index: {}]   ;;  %s5018_s4 = inlined_call_operand.hbm [shape: f32[2,1,384], index: 4, kind: input, shape index: {}]   ;;  %s5019_s5 = inlined_call_operand.hbm [shape: f32[2,128,128], index: 5, kind: input, shape index: {}]   ;;  %s5020_s6 = inlined_call_operand.hbm [shape: f32[2,1,128], index: 6, kind: input, shape index: {}]   ;;  %s5021_s7 = inlined_call_operand.hbm [shape: f32[2,1,128], index: 7, kind: input, shape index: {}]   ;;  %s5022_s8 = inlined_call_operand.hbm [shape: f32[2,1,128], index: 8, kind: input, shape index: {}]   ;;  %s5023_s9 = inlined_call_operand.hbm [shape: f32[2,128,128], index: 9, kind: input, shape index: {}]   ;;  %s5024_s10 = inlined_call_operand.hbm [shape: f32[2,1,128], index: 10, kind: input, shape index: {}]   ;;  %s5025_s11 = inlined_call_operand.hbm [shape: f32[2,128,128], index: 11, kind: input, shape index: {}]   ;;  %s5026_s12 = inlined_call_operand.hbm [shape: f32[2,1,128], index: 12, kind: input, shape index: {}]   ;;  %s5027_s13 = inlined_call_operand.hbm [shape: f32[2,16,128], index: 13, kind: output, shape index: {}]  }
   0x1   :  { %5063 = sst [smem:[#allocation48_spill]] %s5014_s0 }
   0x2   :  { %5064 = sst [smem:[#allocation49_spill]] %s5015_s1 }
   0x3   :  { %5065 = sst [smem:[#allocation50_spill]] %s5016_s2 }
   0x4   :  { %5066 = sst [smem:[#allocation51_spill]] %s5017_s3 }
   0x5   :  { %5067 = sst [smem:[#allocation52_spill]] %s5018_s4 }
   0x6   :  { %5068 = sst [smem:[#allocation53_spill]] %s5019_s5 }
   0x7   :  { %5069 = sst [smem:[#allocation54_spill]] %s5020_s6 }
   0x8   :  { %5070 = sst [smem:[#allocation55_spill]] %s5021_s7 }
   0x9   :  { %5071 = sst [smem:[#allocation56_spill]] %s5022_s8 }
   0xa   :  { %5072 = sst [smem:[#allocation57_spill]] %s5023_s9 }
   0xb   :  { %5073 = sst [smem:[#allocation58_spill]] %s5024_s10 }
   0xc   :  { %5074 = sst [smem:[#allocation59_spill]] %s5025_s11 }
   0xd   :  { %5075 = sst [smem:[#allocation60_spill]] %s5026_s12 }
   0xe   :  { %5076 = sst [smem:[#allocation61_spill]] %s5027_s13 }
   0xf   :  { %18 = vsyncpa [#allocation4], 0 }
  0x10   :  { %20 = vsyncpa [#allocation4 + $0x1], 0 }
  0x11   :  { %21 = vsyncpa [#allocation7], 0 }
  0x12   :  { %23 = vsyncpa [#allocation7 + $0x1], 0 }
  0x13   :  { %24 = vsyncpa [#allocation10], 0 }
  0x14   :  { %26 = vsyncpa [#allocation10 + $0x1], 0 }
  0x15   :  { %27 = vsyncpa [#allocation13], 0 }
  0x16   :  { %29 = vsyncpa [#allocation13 + $0x1], 0 }
  0x17   :  { %30 = vsyncpa [#allocation16], 0 }
  0x18   :  { %32 = vsyncpa [#allocation16 + $0x1], 0 }
  0x19   :  { %33 = vsyncpa [#allocation19], 0 }
  0x1a   :  { %35 = vsyncpa [#allocation19 + $0x1], 0 }
  0x1b   :  { %36 = vsyncpa [#allocation22], 0 }
  0x1c   :  { %38 = vsyncpa [#allocation22 + $0x1], 0 }
  0x1d   :  { %39 = vsyncpa [#allocation5], 0 }
  0x1e   :  { %41 = vsyncpa [#allocation5 + $0x1], 0  ;;  %s4022_s25 = smov 0   ;;  %s4024_s26 = smov 0  }
  0x1f   :  { %s4026_s27 = smov 0   ;;  %s4028_s28 = smov 0  }
  0x20   :  { %s4030_s29 = smov 0   ;;  %s4032_s30 = smov 0  }
  0x21   :  { %s4034_s14 = smov 0   ;;  %s4036_s15 = smov 0  }
  0x22   :  { %s4038_s16 = smov 0   ;;  %s4040_s17 = smov 0  }
  0x23   :  { %s4042_s18 = smov 0   ;;  %s4044_s19 = smov 0  }
  0x24   :  { %s4046_s20 = smov 0   ;;  %s4048_s21 = smov 0  }
  0x25 LB: > { %5077 = sst [smem:[#allocation33_spill]] %s3874_s25  ;;  %p5037_p0 = scmp.eq.s32.totalorder %s3926_s21, 0  ;;  %s3926_s21 = sphi %s4048_s21, %s47_s21   ;;  %s3922_s20 = sphi %s4046_s20, %s5171_s20   ;;  %s3918_s19 = sphi %s4044_s19, %s5177_s19   ;;  %s3914_s18 = sphi %s4042_s18, %s5169_s18   ;;  %s3910_s17 = sphi %s4040_s17, %s5176_s17   ;;  %s3906_s16 = sphi %s4038_s16, %s5168_s16   ;;  %s3902_s15 = sphi %s4036_s15, %s5175_s15   ;;  %s3898_s14 = sphi %s4034_s14, %s5174_s14   ;;  %s3894_s30 = sphi %s4032_s30, %s5173_s30   ;;  %s3890_s29 = sphi %s4030_s29, %s5165_s29   ;;  %s3886_s28 = sphi %s4028_s28, %s5164_s28   ;;  %s3882_s27 = sphi %s4026_s27, %s5163_s27   ;;  %s3878_s26 = sphi %s4024_s26, %s5162_s26   ;;  %s3874_s25 = sphi %s4022_s25, %s5161_s25  }
  0x26   : > { %5078 = sst [smem:[#allocation34_spill]] %s3878_s26  ;;  %p99_p1 = scmp.ne.s32.totalorder %s3894_s30, %s3890_s29 }
  0x27   : > { %5079 = sst [smem:[#allocation35_spill]] %s3882_s27  ;;  %p5036_p2 = scmp.lt.s32.totalorder %s3926_s21, 4 }
  0x28   : > { %5080 = sst [smem:[#allocation36_spill]] %s3890_s29  ;;  %p101_p3 = por %p99_p1, %p5037_p0 }
  0x29   : > { %5081 = sst [smem:[#allocation37_spill]] %s3894_s30  ;;  %s4099_s22 = sand.u32 1, %s3926_s21  }
  0x2a   : > { %5082 = sst [smem:[#allocation38_spill]] %s3906_s16  ;;  %s4102_s23 = sand.u32 1, %s3894_s30  }
  0x2b   : > { %5083 = sst [smem:[#allocation39_spill]] %s3910_s17  ;;  %s4105_s24 = sshll.u32 %s3918_s19, 4 }
  0x2c   : > { %5084 = sst [smem:[#allocation40_spill]] %s3914_s18  ;;  %s5086_s1 = sld [smem:[#allocation49_spill]] }
  0x2d   : > { %5085 = sst [smem:[#allocation41_spill]] %s3922_s20  ;;  %s464_s12 = scalar_lea.vmem [#allocation6], %s4102_s23 }
  0x2e   : > { %s471_s10 = sshll.u32 %s464_s12, 4  ;;  %p4118_p4 = pnand %p5036_p2, %p101_p3  ;;  %s4114_s10 = int_to_ptr.vmem [resolvable:$true] %s471_s10 }
  0x30   : > { %s5087_s8 = scalar_select %p4118_p4, 1, 0 }
  0x31   : > { %p4129_p8 = pneg %p4118_p4 }
  0x32   : > { %s4111_s17 = scalar_lea.hbm %s5086_s1, %s4105_s24  ;;  %s3371_s2 = scalar_lea.hbm %s5086_s1, 32 }
  0x33   : > { %s3366_s13 = scalar_lea.hbm %s4111_s17, 16  ;;  %p3372_p11 = scmp.lt.u32.totalorder %s4111_s17, %s5086_s1 }
  0x34   : > { %p3367_p7 = scmp.ne.s32.totalorder %s4111_s17, %s3366_s13  ;;  %p3373_p12 = scmp.lt.u32.totalorder %s3371_s2, %s3366_s13 }
  0x35   : > { %p3375_p1 = scmp.lt.u32.totalorder %s3366_s13, %s4111_s17 }
  0x36   : > { %p3369_p9 = pnand %p4129_p8, %p3367_p7  ;;  %p3374_p13 = por %p3373_p12, %p3372_p11 }
  0x38   : > { %p3370_p10 = pneg %p3369_p9  ;;  %p3376_p3 = por %p3375_p1, %p3374_p13 }
  0x3a   : > { %p3377_p2 = pnand %p3376_p3, %p3370_p10 }
  0x3c   : > { %3380 = shalt.err (!%p3377_p2)
}
  0x3d   : > { %s3381_s6 = scalar_lea.vmem %s4114_s10, 16  ;;  %s3928_s4 = smov [#allocation6]  }
  0x3e   : > { %p3382_p7 = scmp.ne.s32.totalorder %s4114_s10, %s3381_s6  ;;  %s3386_s12 = sshll.u32 %s3928_s4, 4  ;;  %s3387_s12 = int_to_ptr.vmem [resolvable:$false] %s3386_s12 }
  0x3f   : > { %s3388_s0 = scalar_lea.vmem %s3387_s12, 32  ;;  %p3389_p5 = scmp.lt.s32.totalorder %s4114_s10, %s3387_s12 }
  0x40   : > { %p3384_p9 = pnand %p3382_p7, %p4129_p8  ;;  %p3390_p6 = scmp.lt.s32.totalorder %s3388_s0, %s3381_s6 }
  0x42   : > { %p3385_p0 = pneg %p3384_p9  ;;  %p3391_p11 = por %p3390_p6, %p3389_p5 }
  0x44   : > { %p3392_p12 = pnand %p3391_p11, %p3385_p0 }
  0x46   : > { %3395 = shalt.err (!%p3392_p12)
}
  0x47   : > { %s5089_s2 = scalar_lea.sflag [#allocation7], %s4099_s22  ;;  %p5090_p2 = scmp.lt.s32.totalorder %s3926_s21, 5 }
  0x48   : > { %3182 = dma.hbm_to_vmem [thread:$0]  (!%p4118_p4), %s4111_s17, 16, %s4114_s10, %s5089_s2  }
  0x49   : > { %p5091_p10 = scmp.ge.s32.totalorder %s3926_s21, 1  ;;  %s3142_s25 = smul.u32 384, %s4102_s23 }
  0x4a   : > { %s3143_s13 = smul.u32 6144, %s3918_s19  ;;  %s5094_s3 = sld [smem:[#allocation51_spill]] }
  0x4b   : > { %p4158_p13 = pnand %p5091_p10, %p5090_p2  ;;  %s499_s1 = scalar_lea.vmem [#allocation9], %s3142_s25 }
  0x4c   : > { %s506_s26 = sshll.u32 %s499_s1, 4  ;;  %s5041_s10 = scalar_lea.sflag [#allocation10], %s4099_s22  ;;  %s4169_s26 = int_to_ptr.vmem [resolvable:$true] %s506_s26 }
  0x4d   : > { %s5092_s6 = scalar_select %p4158_p13, 1, 0 }
  0x4f   : > { %5093 = sst [smem:[#allocation42_spill]] %s5092_s6 }
  0x50   : > { %s4167_s0 = scalar_lea.hbm %s5094_s3, %s3143_s13  ;;  %s3401_s4 = scalar_lea.hbm %s5094_s3, 12288 }
  0x51   : > { %s3396_s17 = scalar_lea.hbm %s4167_s0, 6144  ;;  %p3402_p1 = scmp.lt.u32.totalorder %s4167_s0, %s5094_s3 }
  0x52   : > { %p3397_p0 = scmp.ne.s32.totalorder %s4167_s0, %s3396_s17  ;;  %p3403_p3 = scmp.lt.u32.totalorder %s3401_s4, %s3396_s17 }
  0x53   : > { %p3405_p9 = scmp.lt.u32.totalorder %s3396_s17, %s4167_s0 }
  0x54   : > { %p3399_p5 = pnand %p3397_p0, %p4129_p8  ;;  %p3404_p7 = por %p3403_p3, %p3402_p1 }
  0x56   : > { %p3400_p6 = pneg %p3399_p5  ;;  %p3406_p11 = por %p3405_p9, %p3404_p7 }
  0x58   : > { %p3407_p12 = pnand %p3406_p11, %p3400_p6 }
  0x5a   : > { %3410 = shalt.err (!%p3407_p12)
}
  0x5b   : > { %s3411_s1 = scalar_lea.vmem %s4169_s26, 6144  ;;  %s3929_s6 = smov [#allocation9]  }
  0x5c   : > { %p3412_p2 = scmp.ne.s32.totalorder %s4169_s26, %s3411_s1  ;;  %s3416_s25 = sshll.u32 %s3929_s6, 4  ;;  %s3417_s25 = int_to_ptr.vmem [resolvable:$false] %s3416_s25 }
  0x5d   : > { %s3418_s2 = scalar_lea.vmem %s3417_s25, 12288  ;;  %p3419_p5 = scmp.lt.s32.totalorder %s4169_s26, %s3417_s25 }
  0x5e   : > { %p3414_p10 = pnand %p3412_p2, %p4129_p8  ;;  %p3420_p13 = scmp.lt.s32.totalorder %s3418_s2, %s3411_s1 }
  0x60   : > { %p3415_p0 = pneg %p3414_p10  ;;  %p3421_p1 = por %p3420_p13, %p3419_p5 }
  0x62   : > { %p3422_p3 = pnand %p3421_p1, %p3415_p0 }
  0x64   : > { %3425 = shalt.err (!%p3422_p3)
}
  0x65   : > { %s3930_s17 = smov 384   ;;  %s3931_s4 = smov 24  }
  0x66   : > { %3188 = dma.hbm_to_vmem [thread:$0]  (!%p4118_p4), %s4167_s0, 6144, %s4169_s26, %s5041_s10, %s3930_s17, %s3930_s17, %s3931_s4  }
  0x67   : > { %s4196_s13 = sshll.u32 %s4102_s23, 7  ;;  %s4199_s12 = sshll.u32 %s3918_s19, 11 }
  0x68   : > { %s5095_s5 = sld [smem:[#allocation53_spill]]  ;;  %s539_s2 = scalar_lea.vmem [#allocation12], %s4196_s13 }
  0x69   : > { %s546_s3 = sshll.u32 %s539_s2, 4  ;;  %s5044_s26 = scalar_lea.sflag [#allocation13], %s4099_s22  ;;  %s4208_s3 = int_to_ptr.vmem [resolvable:$true] %s546_s3 }
  0x6e   : > { %s4205_s25 = scalar_lea.hbm %s5095_s5, %s4199_s12  ;;  %s3431_s1 = scalar_lea.hbm %s5095_s5, 4096 }
  0x6f   : > { %s3426_s0 = scalar_lea.hbm %s4205_s25, 2048  ;;  %p3432_p9 = scmp.lt.u32.totalorder %s4205_s25, %s5095_s5 }
  0x70   : > { %p3427_p13 = scmp.ne.s32.totalorder %s4205_s25, %s3426_s0  ;;  %p3433_p11 = scmp.lt.u32.totalorder %s3431_s1, %s3426_s0 }
  0x71   : > { %p3435_p2 = scmp.lt.u32.totalorder %s3426_s0, %s4205_s25 }
  0x72   : > { %p3429_p6 = pnand %p3427_p13, %p4129_p8  ;;  %p3434_p12 = por %p3433_p11, %p3432_p9 }
  0x74   : > { %p3430_p7 = pneg %p3429_p6  ;;  %p3436_p10 = por %p3435_p2, %p3434_p12 }
  0x76   : > { %p3437_p0 = pnand %p3436_p10, %p3430_p7 }
  0x78   : > { %3440 = shalt.err (!%p3437_p0)
}
  0x79   : > { %s3441_s2 = scalar_lea.vmem %s4208_s3, 2048  ;;  %s3932_s17 = smov [#allocation12]  }
  0x7a   : > { %p3442_p5 = scmp.ne.s32.totalorder %s4208_s3, %s3441_s2  ;;  %s3446_s4 = sshll.u32 %s3932_s17, 4  ;;  %s3447_s4 = int_to_ptr.vmem [resolvable:$false] %s3446_s4 }
  0x7b   : > { %s3448_s10 = scalar_lea.vmem %s3447_s4, 4096  ;;  %p3449_p13 = scmp.lt.s32.totalorder %s4208_s3, %s3447_s4 }
  0x7c   : > { %p3444_p1 = pnand %p3442_p5, %p4129_p8  ;;  %p3450_p6 = scmp.lt.s32.totalorder %s3448_s10, %s3441_s2 }
  0x7e   : > { %p3445_p3 = pneg %p3444_p1  ;;  %p3451_p9 = por %p3450_p6, %p3449_p13 }
  0x80   : > { %p3452_p11 = pnand %p3451_p9, %p3445_p3 }
  0x82   : > { %3455 = shalt.err (!%p3452_p11)
}
  0x83   : > { %s5045_s0 = smov 128   ;;  %s3934_s1 = smov 8  }
  0x84   : > { %3194 = dma.hbm_to_vmem [thread:$0]  (!%p4118_p4), %s4205_s25, 2048, %s4208_s3, %s5044_s26, %s5045_s0, %s5045_s0, %s3934_s1  }
  0x85   : > { %s5096_s7 = sld [smem:[#allocation55_spill]]  ;;  %s576_s4 = scalar_lea.vmem [#allocation15], %s4102_s23 }
  0x86   : > { %s583_s10 = sshll.u32 %s576_s4, 4  ;;  %s5051_s5 = scalar_lea.sflag [#allocation16], %s4099_s22  ;;  %s584_s10 = int_to_ptr.vmem [resolvable:$true] %s583_s10 }
  0x8b   : > { %s4241_s17 = scalar_lea.hbm %s5096_s7, %s4105_s24  ;;  %s3461_s25 = scalar_lea.hbm %s5096_s7, 32 }
  0x8c   : > { %s3456_s27 = scalar_lea.hbm %s4241_s17, 16  ;;  %p3462_p10 = scmp.lt.u32.totalorder %s4241_s17, %s5096_s7 }
  0x8d   : > { %p3457_p7 = scmp.ne.s32.totalorder %s4241_s17, %s3456_s27  ;;  %p3463_p0 = scmp.lt.u32.totalorder %s3461_s25, %s3456_s27 }
  0x8e   : > { %p3465_p1 = scmp.lt.u32.totalorder %s3456_s27, %s4241_s17 }
  0x8f   : > { %p3459_p12 = pnand %p3457_p7, %p4129_p8  ;;  %p3464_p5 = por %p3463_p0, %p3462_p10 }
  0x91   : > { %p3460_p2 = pneg %p3459_p12  ;;  %p3466_p3 = por %p3465_p1, %p3464_p5 }
  0x93   : > { %p3467_p13 = pnand %p3466_p3, %p3460_p2 }
  0x95   : > { %3470 = shalt.err (!%p3467_p13)
}
  0x96   : > { %s3471_s4 = scalar_lea.vmem %s584_s10, 16  ;;  %s3935_s26 = smov [#allocation15]  }
  0x97   : > { %p3472_p6 = scmp.ne.s32.totalorder %s584_s10, %s3471_s4  ;;  %s3476_s0 = sshll.u32 %s3935_s26, 4  ;;  %s3477_s0 = int_to_ptr.vmem [resolvable:$false] %s3476_s0 }
  0x98   : > { %s3478_s29 = scalar_lea.vmem %s3477_s0, 32  ;;  %p3479_p7 = scmp.lt.s32.totalorder %s584_s10, %s3477_s0 }
  0x99   : > { %p3474_p9 = pnand %p3472_p6, %p4129_p8  ;;  %p3480_p12 = scmp.lt.s32.totalorder %s3478_s29, %s3471_s4 }
  0x9b   : > { %p3475_p11 = pneg %p3474_p9  ;;  %p3481_p4 = por %p3480_p12, %p3479_p7 }
  0x9d   : > { %p3482_p0 = pnand %p3481_p4, %p3475_p11 }
  0x9f   : > { %3485 = shalt.err (!%p3482_p0)
}
  0xa0   : > { %p5097_p10 = scmp.ne.s32.totalorder %s5087_s8, 0  ;;  %s5098_s9 = sld [smem:[#allocation57_spill]] }
  0xa1   : > { %s611_s0 = scalar_lea.vmem [#allocation18], %s4196_s13  ;;  %s5050_s6 = scalar_lea.sflag [#allocation19], %s4099_s22 }
  0xa2   : > { %3200 = dma.hbm_to_vmem [thread:$0]  (!%p5097_p10), %s4241_s17, 16, %s584_s10, %s5051_s5  }
  0xa3   : > { %s618_s25 = sshll.u32 %s611_s0, 4  ;;  %s4271_s25 = int_to_ptr.vmem [resolvable:$true] %s618_s25 }
  0xa6   : > { %s4268_s26 = scalar_lea.hbm %s5098_s9, %s4199_s12  ;;  %s3491_s4 = scalar_lea.hbm %s5098_s9, 4096 }
  0xa7   : > { %s3486_s2 = scalar_lea.hbm %s4268_s26, 2048  ;;  %p3492_p1 = scmp.lt.u32.totalorder %s4268_s26, %s5098_s9 }
  0xa8   : > { %p3487_p4 = scmp.ne.s32.totalorder %s4268_s26, %s3486_s2  ;;  %p3493_p3 = scmp.lt.u32.totalorder %s3491_s4, %s3486_s2 }
  0xa9   : > { %p3495_p6 = scmp.lt.u32.totalorder %s3486_s2, %s4268_s26 }
  0xaa   : > { %p3489_p2 = pnand %p3487_p4, %p4129_p8  ;;  %p3494_p13 = por %p3493_p3, %p3492_p1 }
  0xac   : > { %p3490_p5 = pneg %p3489_p2  ;;  %p3496_p9 = por %p3495_p6, %p3494_p13 }
  0xae   : > { %p3497_p11 = pnand %p3496_p9, %p3490_p5 }
  0xb0   : > { %3500 = shalt.err (!%p3497_p11)
}
  0xb1   : > { %s3501_s3 = scalar_lea.vmem %s4271_s25, 2048  ;;  %s3936_s0 = smov [#allocation18]  }
  0xb2   : > { %p3502_p7 = scmp.ne.s32.totalorder %s4271_s25, %s3501_s3  ;;  %s3506_s17 = sshll.u32 %s3936_s0, 4  ;;  %s3507_s17 = int_to_ptr.vmem [resolvable:$false] %s3506_s17 }
  0xb3   : > { %s3508_s10 = scalar_lea.vmem %s3507_s17, 4096  ;;  %p3509_p4 = scmp.lt.s32.totalorder %s4271_s25, %s3507_s17 }
  0xb4   : > { %p3504_p12 = pnand %p3502_p7, %p4129_p8  ;;  %p3510_p2 = scmp.lt.s32.totalorder %s3508_s10, %s3501_s3 }
  0xb6   : > { %p3505_p0 = pneg %p3504_p12  ;;  %p3511_p1 = por %p3510_p2, %p3509_p4 }
  0xb8   : > { %p3512_p3 = pnand %p3511_p1, %p3505_p0 }
  0xba   : > { %3515 = shalt.err (!%p3512_p3)
}
  0xbb   : > { %s5099_s2 = smov 128   ;;  %s5100_s11 = sld [smem:[#allocation59_spill]] }
  0xbc   : > { %3206 = dma.hbm_to_vmem [thread:$0]  (!%p5097_p10), %s4268_s26, 2048, %s4271_s25, %s5050_s6, %s5099_s2, %s5099_s2, %s3934_s1  }
  0xbd   : > { %s649_s3 = scalar_lea.vmem [#allocation21], %s4196_s13  ;;  %s5049_s17 = scalar_lea.sflag [#allocation22], %s4099_s22 }
  0xbe   : > { %s656_s0 = sshll.u32 %s649_s3, 4  ;;  %s4307_s0 = int_to_ptr.vmem [resolvable:$true] %s656_s0 }
  0xc1   : > { %s4304_s27 = scalar_lea.hbm %s5100_s11, %s4199_s12  ;;  %s3521_s4 = scalar_lea.hbm %s5100_s11, 4096 }
  0xc2   : > { %s3516_s10 = scalar_lea.hbm %s4304_s27, 2048  ;;  %p3522_p9 = scmp.lt.u32.totalorder %s4304_s27, %s5100_s11 }
  0xc3   : > { %p3517_p5 = scmp.ne.s32.totalorder %s4304_s27, %s3516_s10  ;;  %p3523_p11 = scmp.lt.u32.totalorder %s3521_s4, %s3516_s10 }
  0xc4   : > { %p3525_p12 = scmp.lt.u32.totalorder %s3516_s10, %s4304_s27 }
  0xc5   : > { %p3519_p13 = pnand %p3517_p5, %p4129_p8  ;;  %p3524_p7 = por %p3523_p11, %p3522_p9 }
  0xc7   : > { %p3520_p6 = pneg %p3519_p13  ;;  %p3526_p0 = por %p3525_p12, %p3524_p7 }
  0xc9   : > { %p3527_p4 = pnand %p3526_p0, %p3520_p6 }
  0xcb   : > { %3530 = shalt.err (!%p3527_p4)
}
  0xcc   : > { %s3531_s13 = scalar_lea.vmem %s4307_s0, 2048  ;;  %s3937_s3 = smov [#allocation21]  }
  0xcd   : > { %p3532_p2 = scmp.ne.s32.totalorder %s4307_s0, %s3531_s13  ;;  %s3536_s26 = sshll.u32 %s3937_s3, 4  ;;  %s3537_s26 = int_to_ptr.vmem [resolvable:$false] %s3536_s26 }
  0xce   : > { %s3538_s25 = scalar_lea.vmem %s3537_s26, 4096  ;;  %p3539_p5 = scmp.lt.s32.totalorder %s4307_s0, %s3537_s26 }
  0xcf   : > { %p3534_p1 = pnand %p3532_p2, %p4129_p8  ;;  %p3540_p13 = scmp.lt.s32.totalorder %s3538_s25, %s3531_s13 }
  0xd1   : > { %p3535_p3 = pneg %p3534_p1  ;;  %p3541_p9 = por %p3540_p13, %p3539_p5 }
  0xd3   : > { %p3542_p11 = pnand %p3541_p9, %p3535_p3 }
  0xd5   : > { %3545 = shalt.err (!%p3542_p11)
}
  0xd6   : > { %3212 = dma.hbm_to_vmem [thread:$0]  (!%p5097_p10), %s4304_s27, 2048, %s4307_s0, %s5049_s17, %s5099_s2, %s5099_s2, %s3934_s1  }
  0xd7   : > { %s4337_s10 = sadd.s32 4294967295, %s3926_s21   ;;  %s56_s12 = sadd.s32 1, %s3918_s19 }
  0xd8   : > { %p57_p6 = scmp.ge.s32.totalorder %s56_s12, 2  ;;  %s5101_s29 = sld [smem:[#allocation36_spill]] }
  0xd9   : > { %s59_s13 = sadd.s32 1, %s3922_s20  ;;  %s66_s3 = sadd.s32 1, %s3906_s16 }
  0xda   : > { %p73_p7 = scmp.ne.s32.totalorder %s3906_s16, %s3902_s15  ;;  %s5179_s12 = smov (%p57_p6, %s56_s12), 0 }
  0xdb   : > { %5102 = sst [smem:[#allocation43_spill]] %s5179_s12  ;;  %s5181_s13 = smov (!%p57_p6, %s59_s13), %s3922_s20 }
  0xdc   : > { %p5103_p12 = scmp.eq.s32.totalorder %s3926_s21, 0  ;;  %p79_p4 = scmp.ne.s32.totalorder %s3902_s15, %s3898_s14 }
  0xdd   : > { %s5105_s2 = sld [smem:[#allocation35_spill]]  ;;  %p61_p2 = scmp.ge.s32.totalorder %s5181_s13, 2 }
  0xde   : > { %p4350_p0 = por %p5103_p12, %p73_p7  ;;  %s5106_s27 = sld [smem:[#allocation34_spill]] }
  0xdf   : > { %p80_p1 = scmp.eq.s32.totalorder %s4337_s10, 0  ;;  %s89_s0 = ssub.s32 %s3918_s19, %s5179_s12 }
  0xe0   : > { %s92_s26 = sadd.s32 1, %s3894_s30  ;;  %s5107_s25 = sld [smem:[#allocation33_spill]] }
  0xe1   : > { %s5183_s13 = smov (%p61_p2, %s5181_s13), 0  ;;  %p4362_p3 = por %p80_p1, %p79_p4 }
  0xe2   : > { %5108 = sst [smem:[#allocation44_spill]] %s5183_s13  ;;  %p90_p5 = scmp.eq.s32.totalorder %s89_s0, 0 }
  0xe3   : > { %s5109_s17 = scalar_select %p4362_p3, 1, 0 }
  0xe4   : > { %s63_s14 = ssub.s32 %s3922_s20, %s5183_s13  ;;  %p105_p13 = scmp.ne.s32.totalorder %s5101_s29, %s3886_s28 }
  0xe5   : > { %p64_p9 = scmp.eq.s32.totalorder %s63_s14, 0  ;;  %s403_s6 = sor.u32 %s89_s0, %s63_s14 }
  0xe6   : > { %s4371_s5 = scalar_select %p90_p5, %s3894_s30, %s92_s26  }
  0xe7   : > { %s4374_s4 = scalar_select %p64_p9, %s3906_s16, %s66_s3  }
  0xe8   : > { %5110 = sst [smem:[#allocation45_spill]] %s4371_s5  ;;  %p4376_p11 = por %p105_p13, %p80_p1 }
  0xe9   : > { %5111 = sst [smem:[#allocation46_spill]] %s4374_s4  ;;  %p404_p6 = scmp.eq.s32.totalorder %s403_s6, 0 }
  0xea   : > { %s5112_s7 = scalar_select %p4376_p11, 1, 0 }
  0xeb   : > { %s406_s9 = sadd.s32 1, %s5105_s2  ;;  %p416_p7 = scmp.ne.s32.totalorder %s5105_s2, %s5106_s27 }
  0xec   : > { %s5185_s2 = smov (!%p404_p6, %s5105_s2), %s406_s9  ;;  %p417_p12 = scmp.eq.s32.totalorder %s4337_s10, 3 }
  0xed   : > { %5113 = sst [smem:[#allocation47_spill]] %s5185_s2  ;;  %p422_p4 = scmp.ne.s32.totalorder %s5106_s27, %s5107_s25 }
  0xee   : > { %s5114_s28 = sadd.s32 4294967294, %s3926_s21   ;;  %s443_s29 = sand.u32 1, %s3906_s16  }
  0xef   : > { %p423_p2 = scmp.eq.s32.totalorder %s5114_s28, 3  ;;  %p4392_p5 = por %p417_p12, %p416_p7 }
  0xf0   : > { %s2679_s6 = sshll.u32 %s443_s29, 3  ;;  %s2680_s26 = sshll.u32 %s3922_s20, 7 }
  0xf1   : > { %s5115_s3 = scalar_select %p4392_p5, 1, 0 }
  0xf2   : > { %p4396_p1 = por %p423_p2, %p422_p4  ;;  %s5117_s13 = sld [smem:[#allocation48_spill]] }
  0xf3   : > { %s447_s27 = scalar_lea.vmem [#allocation3], %s2679_s6  ;;  %p5118_p13 = scmp.lt.s32.totalorder %s3926_s21, 4 }
  0xf4   : > { %s5116_s0 = scalar_select %p4396_p1, 1, 0 }
  0xf5   : > { %s454_s25 = sshll.u32 %s447_s27, 4  ;;  %p4412_p9 = pnand %p5118_p13, %p4350_p0  ;;  %s4406_s25 = int_to_ptr.vmem [resolvable:$true] %s454_s25 }
  0xf6   : > { %s5120_s4 = sld [smem:[#allocation50_spill]]  ;;  %s444_s6 = scalar_lea.sflag [#allocation4], %s443_s29 }
  0xf7   : > { %p3548_p7 = pneg %p4412_p9 }
  0xf8   : > { %s4404_s9 = scalar_lea.hbm %s5117_s13, %s2680_s26  ;;  %s481_s26 = scalar_lea.vmem [#allocation8], %s4102_s23 }
  0xf9   : > { %s4423_s14 = sshll.u32 %s481_s26, 4  ;;  %s3546_s27 = scalar_lea.hbm %s4404_s9, 128  ;;  %s489_s14 = int_to_ptr.vmem [resolvable:$true] %s4423_s14 }
  0xfa   : > { %p3547_p6 = scmp.ne.s32.totalorder %s4404_s9, %s3546_s27  ;;  %s3551_s20 = scalar_lea.hbm %s5117_s13, 256 }
  0xfb   : > { %p3552_p4 = scmp.lt.u32.totalorder %s4404_s9, %s5117_s13  ;;  %p3553_p2 = scmp.lt.u32.totalorder %s3551_s20, %s3546_s27 }
  0xfc   : > { %s4420_s11 = scalar_lea.hbm %s5120_s4, %s4105_s24  ;;  %p3549_p0 = pnand %p3548_p7, %p3547_p6 }
  0xfd   : > { %p3554_p13 = por %p3553_p2, %p3552_p4  ;;  %p3555_p1 = scmp.lt.u32.totalorder %s3546_s27, %s4404_s9 }
  0xfe   : > { %p3550_p12 = pneg %p3549_p0 }
  0xff   : > { %p3556_p5 = por %p3555_p1, %p3554_p13 }
 0x101   : > { %p3557_p11 = pnand %p3556_p5, %p3550_p12 }
 0x103   : > { %3560 = shalt.err (!%p3557_p11)
}
 0x104   : > { %s3561_s29 = scalar_lea.vmem %s4406_s25, 128  ;;  %s3938_s16 = smov [#allocation3]  }
 0x105   : > { %p3562_p6 = scmp.ne.s32.totalorder %s4406_s25, %s3561_s29  ;;  %s3566_s26 = sshll.u32 %s3938_s16, 4  ;;  %s3567_s26 = int_to_ptr.vmem [resolvable:$false] %s3566_s26 }
 0x106   : > { %s3568_s5 = scalar_lea.vmem %s3567_s26, 256  ;;  %p3569_p10 = scmp.lt.s32.totalorder %s4406_s25, %s3567_s26 }
 0x107   : > { %p3564_p0 = pnand %p3562_p6, %p3548_p7  ;;  %p3570_p4 = scmp.lt.s32.totalorder %s3568_s5, %s3561_s29 }
 0x109   : > { %p3565_p3 = pneg %p3564_p0  ;;  %p3571_p2 = por %p3570_p4, %p3569_p10 }
 0x10b   : > { %p3572_p1 = pnand %p3571_p2, %p3565_p3 }
 0x10d   : > { %3575 = shalt.err (!%p3572_p1)
}
 0x10e   : > { %3179 = dma.hbm_to_vmem [thread:$0]  (!%p4412_p9), %s4404_s9, 128, %s4406_s25, %s444_s6  }
 0x10f   : > { %s3144_s27 = smul.u32 3, %s4102_s23  ;;  %s3576_s1 = scalar_lea.hbm %s4420_s11, 16 }
 0x110   : > { %p3577_p11 = scmp.ne.s32.totalorder %s4420_s11, %s3576_s1  ;;  %s3581_s28 = scalar_lea.hbm %s5120_s4, 32 }
 0x111   : > { %p3582_p5 = scmp.lt.u32.totalorder %s4420_s11, %s5120_s4  ;;  %p3583_p7 = scmp.lt.u32.totalorder %s3581_s28, %s3576_s1 }
 0x112   : > { %p3579_p10 = pnand %p3577_p11, %p4129_p8  ;;  %p3585_p13 = scmp.lt.u32.totalorder %s3576_s1, %s4420_s11 }
 0x113   : > { %p3584_p12 = por %p3583_p7, %p3582_p5 }
 0x114   : > { %p3580_p3 = pneg %p3579_p10 }
 0x115   : > { %p3586_p6 = por %p3585_p13, %p3584_p12 }
 0x117   : > { %p3587_p9 = pnand %p3586_p6, %p3580_p3 }
 0x119   : > { %3590 = shalt.err (!%p3587_p9)
}
 0x11a   : > { %s3591_s9 = scalar_lea.vmem %s489_s14, 16  ;;  %s3939_s25 = smov [#allocation8]  }
 0x11b   : > { %p3592_p0 = scmp.ne.s32.totalorder %s489_s14, %s3591_s9  ;;  %s3596_s6 = sshll.u32 %s3939_s25, 4  ;;  %s3597_s6 = int_to_ptr.vmem [resolvable:$false] %s3596_s6 }
 0x11c   : > { %s3598_s26 = scalar_lea.vmem %s3597_s6, 32  ;;  %p3599_p1 = scmp.lt.s32.totalorder %s489_s14, %s3597_s6 }
 0x11d   : > { %p3594_p4 = pnand %p3592_p0, %p4129_p8  ;;  %p3600_p11 = scmp.lt.s32.totalorder %s3598_s26, %s3591_s9 }
 0x11f   : > { %p3595_p2 = pneg %p3594_p4  ;;  %p3601_p10 = por %p3600_p11, %p3599_p1 }
 0x121   : > { %p3602_p5 = pnand %p3601_p10, %p3595_p2 }
 0x123   : > { %3605 = shalt.err (!%p3602_p5)
}
 0x124   : > { %p5121_p7 = scmp.ne.s32.totalorder %s5087_s8, 0  ;;  %s5122_s5 = scalar_lea.sflag [#allocation7], %s4099_s22 }
 0x125   : > { %s3145_s1 = smul.u32 48, %s3918_s19  ;;  %s520_s20 = scalar_lea.vmem [#allocation11], %s3144_s27 }
 0x126   : > { %3185 = dma.hbm_to_vmem [thread:$0]  (!%p5121_p7), %s4420_s11, 16, %s489_s14, %s5122_s5  }
 0x127   : > { %s528_s12 = sshll.u32 %s520_s20, 4  ;;  %s5123_s16 = sld [smem:[#allocation52_spill]]  ;;  %s529_s12 = int_to_ptr.vmem [resolvable:$true] %s528_s12 }
 0x12d   : > { %s5124_s4 = smov %s5123_s16  ;;  %s526_s25 = scalar_lea.hbm %s5123_s16, %s3145_s1 }
 0x12e   : > { %s3606_s9 = scalar_lea.hbm %s526_s25, 48  ;;  %s3611_s13 = scalar_lea.hbm %s5124_s4, 96 }
 0x12f   : > { %p3607_p3 = scmp.ne.s32.totalorder %s526_s25, %s3606_s9  ;;  %p3612_p6 = scmp.lt.u32.totalorder %s526_s25, %s5124_s4 }
 0x130   : > { %p3613_p9 = scmp.lt.u32.totalorder %s3611_s13, %s3606_s9  ;;  %p3615_p4 = scmp.lt.u32.totalorder %s3606_s9, %s526_s25 }
 0x131   : > { %p3609_p12 = pnand %p3607_p3, %p4129_p8 }
 0x132   : > { %p3614_p0 = por %p3613_p9, %p3612_p6 }
 0x133   : > { %p3610_p13 = pneg %p3609_p12 }
 0x134   : > { %p3616_p2 = por %p3615_p4, %p3614_p0 }
 0x136   : > { %p3617_p1 = pnand %p3616_p2, %p3610_p13 }
 0x138   : > { %3620 = shalt.err (!%p3617_p1)
}
 0x139   : > { %s3621_s11 = scalar_lea.vmem %s529_s12, 48  ;;  %s3940_s14 = smov [#allocation11]  }
 0x13a   : > { %p3622_p11 = scmp.ne.s32.totalorder %s529_s12, %s3621_s11  ;;  %s3626_s27 = sshll.u32 %s3940_s14, 4  ;;  %s3627_s27 = int_to_ptr.vmem [resolvable:$false] %s3626_s27 }
 0x13b   : > { %s3628_s5 = scalar_lea.vmem %s3627_s27, 96  ;;  %p3629_p3 = scmp.lt.s32.totalorder %s529_s12, %s3627_s27 }
 0x13c   : > { %p3624_p10 = pnand %p3622_p11, %p4129_p8  ;;  %p3630_p12 = scmp.lt.s32.totalorder %s3628_s5, %s3621_s11 }
 0x13e   : > { %p3625_p5 = pneg %p3624_p10  ;;  %p3631_p7 = por %p3630_p12, %p3629_p3 }
 0x140   : > { %p3632_p6 = pnand %p3631_p7, %p3625_p5 }
 0x142   : > { %3635 = shalt.err (!%p3632_p6)
}
 0x143   : > { %p5125_p9 = scmp.ne.s32.totalorder %s5087_s8, 0  ;;  %s5126_s30 = scalar_lea.sflag [#allocation10], %s4099_s22 }
 0x144   : > { %s5127_s1 = sld [smem:[#allocation54_spill]]  ;;  %s559_s28 = scalar_lea.vmem [#allocation14], %s4102_s23 }
 0x145   : > { %3191 = dma.hbm_to_vmem [thread:$0]  (!%p5125_p9), %s526_s25, 48, %s529_s12, %s5126_s30  }
 0x146   : > { %s566_s29 = sshll.u32 %s559_s28, 4  ;;  %s567_s29 = int_to_ptr.vmem [resolvable:$true] %s566_s29 }
 0x14a   : > { %s4493_s20 = scalar_lea.hbm %s5127_s1, %s4105_s24  ;;  %s3641_s12 = scalar_lea.hbm %s5127_s1, 32 }
 0x14b   : > { %s3636_s16 = scalar_lea.hbm %s4493_s20, 16  ;;  %p3642_p4 = scmp.lt.u32.totalorder %s4493_s20, %s5127_s1 }
 0x14c   : > { %p3637_p7 = scmp.ne.s32.totalorder %s4493_s20, %s3636_s16  ;;  %p3643_p2 = scmp.lt.u32.totalorder %s3641_s12, %s3636_s16 }
 0x14d   : > { %p3645_p11 = scmp.lt.u32.totalorder %s3636_s16, %s4493_s20 }
 0x14e   : > { %p3639_p13 = pnand %p3637_p7, %p4129_p8  ;;  %p3644_p1 = por %p3643_p2, %p3642_p4 }
 0x150   : > { %p3640_p0 = pneg %p3639_p13  ;;  %p3646_p10 = por %p3645_p11, %p3644_p1 }
 0x152   : > { %p3647_p5 = pnand %p3646_p10, %p3640_p0 }
 0x154   : > { %3650 = shalt.err (!%p3647_p5)
}
 0x155   : > { %s3651_s11 = scalar_lea.vmem %s567_s29, 16  ;;  %s3941_s14 = smov [#allocation14]  }
 0x156   : > { %p3652_p3 = scmp.ne.s32.totalorder %s567_s29, %s3651_s11  ;;  %s3656_s27 = sshll.u32 %s3941_s14, 4  ;;  %s3657_s27 = int_to_ptr.vmem [resolvable:$false] %s3656_s27 }
 0x157   : > { %s3658_s5 = scalar_lea.vmem %s3657_s27, 32  ;;  %p3659_p7 = scmp.lt.s32.totalorder %s567_s29, %s3657_s27 }
 0x158   : > { %p3654_p12 = pnand %p3652_p3, %p4129_p8  ;;  %p3660_p13 = scmp.lt.s32.totalorder %s3658_s5, %s3651_s11 }
 0x15a   : > { %p3655_p6 = pneg %p3654_p12  ;;  %p3661_p9 = por %p3660_p13, %p3659_p7 }
 0x15c   : > { %p3662_p2 = pnand %p3661_p9, %p3655_p6 }
 0x15e   : > { %3665 = shalt.err (!%p3662_p2)
}
 0x15f   : > { %p5128_p4 = scmp.ne.s32.totalorder %s5087_s8, 0  ;;  %s5129_s30 = scalar_lea.sflag [#allocation13], %s4099_s22 }
 0x160   : > { %s5130_s28 = sld [smem:[#allocation56_spill]]  ;;  %s593_s6 = scalar_lea.vmem [#allocation17], %s4102_s23 }
 0x161   : > { %3197 = dma.hbm_to_vmem [thread:$0]  (!%p5128_p4), %s4493_s20, 16, %s567_s29, %s5129_s30  }
 0x162   : > { %s600_s12 = sshll.u32 %s593_s6, 4  ;;  %s601_s12 = int_to_ptr.vmem [resolvable:$true] %s600_s12 }
 0x166   : > { %s5131_s9 = smov %s5130_s28  ;;  %s4519_s16 = scalar_lea.hbm %s5130_s28, %s4105_s24 }
 0x167   : > { %s3666_s25 = scalar_lea.hbm %s4519_s16, 16  ;;  %s3671_s20 = scalar_lea.hbm %s5131_s9, 32 }
 0x168   : > { %p3667_p9 = scmp.ne.s32.totalorder %s4519_s16, %s3666_s25  ;;  %p3672_p11 = scmp.lt.u32.totalorder %s4519_s16, %s5131_s9 }
 0x169   : > { %p3673_p10 = scmp.lt.u32.totalorder %s3671_s20, %s3666_s25  ;;  %p3675_p3 = scmp.lt.u32.totalorder %s3666_s25, %s4519_s16 }
 0x16a   : > { %p3669_p0 = pnand %p3667_p9, %p4129_p8 }
 0x16b   : > { %p3674_p5 = por %p3673_p10, %p3672_p11 }
 0x16c   : > { %p3670_p1 = pneg %p3669_p0 }
 0x16d   : > { %p3676_p12 = por %p3675_p3, %p3674_p5 }
 0x16f   : > { %p3677_p6 = pnand %p3676_p12, %p3670_p1 }
 0x171   : > { %3680 = shalt.err (!%p3677_p6)
}
 0x172   : > { %s3681_s27 = scalar_lea.vmem %s601_s12, 16  ;;  %s3942_s5 = smov [#allocation17]  }
 0x173   : > { %p3682_p7 = scmp.ne.s32.totalorder %s601_s12, %s3681_s27  ;;  %s3686_s30 = sshll.u32 %s3942_s5, 4  ;;  %s3687_s30 = int_to_ptr.vmem [resolvable:$false] %s3686_s30 }
 0x174   : > { %s3688_s13 = scalar_lea.vmem %s3687_s30, 32  ;;  %p3689_p9 = scmp.lt.s32.totalorder %s601_s12, %s3687_s30 }
 0x175   : > { %p3684_p13 = pnand %p3682_p7, %p4129_p8  ;;  %p3690_p0 = scmp.lt.s32.totalorder %s3688_s13, %s3681_s27 }
 0x177   : > { %p3685_p2 = pneg %p3684_p13  ;;  %p3691_p4 = por %p3690_p0, %p3689_p9 }
 0x179   : > { %p3692_p10 = pnand %p3691_p4, %p3685_p2 }
 0x17b   : > { %3695 = shalt.err (!%p3692_p10)
}
 0x17c   : > { %p5132_p11 = scmp.ne.s32.totalorder %s5087_s8, 0  ;;  %s5133_s2 = scalar_lea.sflag [#allocation16], %s4099_s22 }
 0x17d   : > { %s5134_s25 = sld [smem:[#allocation58_spill]]  ;;  %s631_s20 = scalar_lea.vmem [#allocation20], %s4102_s23 }
 0x17e   : > { %3203 = dma.hbm_to_vmem [thread:$0]  (!%p5132_p11), %s4519_s16, 16, %s601_s12, %s5133_s2  }
 0x17f   : > { %s638_s29 = sshll.u32 %s631_s20, 4  ;;  %s639_s29 = int_to_ptr.vmem [resolvable:$true] %s638_s29 }
 0x183   : > { %s5135_s11 = smov %s5134_s25  ;;  %s4545_s26 = scalar_lea.hbm %s5134_s25, %s4105_s24 }
 0x184   : > { %s3696_s14 = scalar_lea.hbm %s4545_s26, 16  ;;  %s3701_s16 = scalar_lea.hbm %s5135_s11, 32 }
 0x185   : > { %p3697_p4 = scmp.ne.s32.totalorder %s4545_s26, %s3696_s14  ;;  %p3702_p3 = scmp.lt.u32.totalorder %s4545_s26, %s5135_s11 }
 0x186   : > { %p3703_p12 = scmp.lt.u32.totalorder %s3701_s16, %s3696_s14  ;;  %p3705_p7 = scmp.lt.u32.totalorder %s3696_s14, %s4545_s26 }
 0x187   : > { %p3699_p1 = pnand %p3697_p4, %p4129_p8 }
 0x188   : > { %p3704_p6 = por %p3703_p12, %p3702_p3 }
 0x189   : > { %p3700_p5 = pneg %p3699_p1 }
 0x18a   : > { %p3706_p13 = por %p3705_p7, %p3704_p6 }
 0x18c   : > { %p3707_p2 = pnand %p3706_p13, %p3700_p5 }
 0x18e   : > { %3710 = shalt.err (!%p3707_p2)
}
 0x18f   : > { %s3711_s13 = scalar_lea.vmem %s639_s29, 16  ;;  %s3943_s2 = smov [#allocation20]  }
 0x190   : > { %p3712_p9 = scmp.ne.s32.totalorder %s639_s29, %s3711_s13  ;;  %s3716_s28 = sshll.u32 %s3943_s2, 4  ;;  %s3717_s28 = int_to_ptr.vmem [resolvable:$false] %s3716_s28 }
 0x191   : > { %s3718_s6 = scalar_lea.vmem %s3717_s28, 32  ;;  %p3719_p4 = scmp.lt.s32.totalorder %s639_s29, %s3717_s28 }
 0x192   : > { %p3714_p0 = pnand %p3712_p9, %p4129_p8  ;;  %p3720_p1 = scmp.lt.s32.totalorder %s3718_s6, %s3711_s13 }
 0x194   : > { %p3715_p10 = pneg %p3714_p0  ;;  %p3721_p11 = por %p3720_p1, %p3719_p4 }
 0x196   : > { %p3722_p3 = pnand %p3721_p11, %p3715_p10 }
 0x198   : > { %3725 = shalt.err (!%p3722_p3)
}
 0x199   : > { %p5136_p12 = scmp.ne.s32.totalorder %s5087_s8, 0  ;;  %s5137_s25 = scalar_lea.sflag [#allocation19], %s4099_s22 }
 0x19a   : > { %s5138_s27 = sld [smem:[#allocation60_spill]]  ;;  %s669_s12 = scalar_lea.vmem [#allocation23], %s4102_s23 }
 0x19b   : > { %3209 = dma.hbm_to_vmem [thread:$0]  (!%p5136_p12), %s4545_s26, 16, %s639_s29, %s5137_s25  }
 0x19c   : > { %s676_s30 = sshll.u32 %s669_s12, 4  ;;  %s677_s30 = int_to_ptr.vmem [resolvable:$true] %s676_s30 }
 0x1a0   : > { %s5139_s5 = smov %s5138_s27  ;;  %s4571_s16 = scalar_lea.hbm %s5138_s27, %s4105_s24 }
 0x1a1   : > { %s3726_s13 = scalar_lea.hbm %s4571_s16, 16  ;;  %s3731_s26 = scalar_lea.hbm %s5139_s5, 32 }
 0x1a2   : > { %p3727_p11 = scmp.ne.s32.totalorder %s4571_s16, %s3726_s13  ;;  %p3732_p7 = scmp.lt.u32.totalorder %s4571_s16, %s5139_s5 }
 0x1a3   : > { %p3733_p13 = scmp.lt.u32.totalorder %s3731_s26, %s3726_s13  ;;  %p3735_p9 = scmp.lt.u32.totalorder %s3726_s13, %s4571_s16 }
 0x1a4   : > { %p3729_p5 = pnand %p3727_p11, %p4129_p8 }
 0x1a5   : > { %p3734_p2 = por %p3733_p13, %p3732_p7 }
 0x1a6   : > { %p3730_p6 = pneg %p3729_p5 }
 0x1a7   : > { %p3736_p0 = por %p3735_p9, %p3734_p2 }
 0x1a9   : > { %p3737_p10 = pnand %p3736_p0, %p3730_p6 }
 0x1ab   : > { %3740 = shalt.err (!%p3737_p10)
}
 0x1ac   : > { %s3741_s23 = scalar_lea.vmem %s677_s30, 16  ;;  %s3944_s24 = smov [#allocation23]  }
 0x1ad   : > { %p3742_p4 = scmp.ne.s32.totalorder %s677_s30, %s3741_s23  ;;  %s3746_s25 = sshll.u32 %s3944_s24, 4  ;;  %s3747_s25 = int_to_ptr.vmem [resolvable:$false] %s3746_s25 }
 0x1ae   : > { %s3748_s20 = scalar_lea.vmem %s3747_s25, 32  ;;  %p3749_p11 = scmp.lt.s32.totalorder %s677_s30, %s3747_s25 }
 0x1af   : > { %p3744_p1 = pnand %p3742_p4, %p4129_p8  ;;  %p3750_p5 = scmp.lt.s32.totalorder %s3748_s20, %s3741_s23 }
 0x1b1   : > { %p3745_p3 = pneg %p3744_p1  ;;  %p3751_p12 = por %p3750_p5, %p3749_p11 }
 0x1b3   : > { %p3752_p7 = pnand %p3751_p12, %p3745_p3 }
 0x1b5   : > { %3755 = shalt.err (!%p3752_p7)
}
 0x1b6   : > { %p5140_p13 = scmp.ne.s32.totalorder %s5087_s8, 0  ;;  %s5141_s14 = scalar_lea.sflag [#allocation22], %s4099_s22 }
 0x1b7   : > { %s5142_s27 = sld [smem:[#allocation42_spill]] }
 0x1b8   : > { %3215 = dma.hbm_to_vmem [thread:$0]  (!%p5140_p13), %s4571_s16, 16, %s677_s30, %s5141_s14  }
 0x1bd   : > { %p5143_p6 = scmp.ne.s32.totalorder %s5142_s27, 0 }
 0x1be   : > { %s687_s18 = sand.u32 (!%p5143_p6), 1, %s3902_s15   ;;  %p5144_p8 = scmp.ne.s32.totalorder (!%p5143_p6), %s5109_s17, 0 }
 0x1bf   : > { %685 = sbr.rel (%p5143_p6) target bundleno = 4153 (0x1039), region = 72  ;;  %s4596_s12 = sshll.u32 (!%p5143_p6), %s687_s18, 3 }
 0x1c0   : > { %s688_s13 = scalar_lea.sflag (!%p5143_p6), [#allocation4], %s687_s18  ;;  %s691_s2 = scalar_lea.vmem (!%p5143_p6), [#allocation3], %s4596_s12 }
 0x1c6   : > { %3841 = dma.done.wait (%p5144_p8), %s688_s13, 128  }
 0x1c7   : > { %3843 = vsyncadd (%p5144_p8), %s688_s13, 4294967168  ;;  %s5145_s8 = sld [smem:[#allocation36_spill]]  ;;  %s4604_s22 = sand.u32 1, %s4337_s10  }
 0x1c8   : > { %s697_s30 = scalar_lea.sflag [#allocation7], %s4604_s22  ;;  %p5146_p12 = scmp.ne.s32.totalorder %s5112_s7, 0 }
 0x1cd   : > { %s4607_s16 = sand.u32 1, %s5145_s8  }
 0x1ce   : > { %s699_s28 = scalar_lea.vmem [#allocation6], %s4607_s16 }
 0x1cf   : > { %3845 = dma.done.wait (%p5146_p12), %s697_s30, 32  }
 0x1d0   : > { %3847 = vsyncadd (%p5146_p12), %s697_s30, 4294967264  ;;  %s3146_s17 = smul.u32 384, %s4607_s16  ;;  %s707_s26 = scalar_lea.vmem [#allocation8], %s4607_s16 }
 0x1d1   : > { %s713_s29 = scalar_lea.sflag [#allocation10], %s4604_s22 }
 0x1d2   : > { %s4618_s10 = scalar_lea.vmem [#allocation9], %s3146_s17 }
 0x1d3   : > { %3849 = dma.done.wait (%p5146_p12), %s713_s29, 6192  }
 0x1d4   : > { %3851 = vsyncadd (%p5146_p12), %s713_s29, 4294961104  ;;  %s3147_s6 = smul.u32 3, %s4607_s16  ;;  %s2701_s23 = sshll.u32 %s4607_s16, 7 }
 0x1d5   : > { %s731_s25 = scalar_lea.sflag [#allocation13], %s4604_s22  ;;  %s4629_s20 = scalar_lea.vmem [#allocation12], %s2701_s23 }
 0x1d6   : > { %s4626_s24 = scalar_lea.vmem [#allocation11], %s3147_s6 }
 0x1d7   : > { %3853 = dma.done.wait (%p5146_p12), %s731_s25, 2064  }
 0x1d8   : > { %3855 = vsyncadd (%p5146_p12), %s731_s25, 4294965232  ;;  %s748_s27 = scalar_lea.sflag [#allocation16], %s4604_s22 }
 0x1d9   : > { %3857 = dma.done.wait (%p5146_p12), %s748_s27, 32  }
 0x1da   : > { %3859 = vsyncadd (%p5146_p12), %s748_s27, 4294967264  ;;  %s764_s8 = scalar_lea.sflag [#allocation19], %s4604_s22  ;;  %s4644_s30 = scalar_lea.vmem [#allocation18], %s2701_s23 }
 0x1db   : > { %3861 = dma.done.wait (%p5146_p12), %s764_s8, 2064  }
 0x1dc   : > { %3863 = vsyncadd (%p5146_p12), %s764_s8, 4294965232  ;;  %s775_s17 = scalar_lea.vmem [#allocation20], %s4607_s16  ;;  %s781_s29 = scalar_lea.sflag [#allocation22], %s4604_s22 }
 0x1dd   : > { %s4652_s6 = scalar_lea.vmem [#allocation21], %s2701_s23 }
 0x1de   : > { %3865 = dma.done.wait (%p5146_p12), %s781_s29, 2064  }
 0x1df   : > { %3867 = vsyncadd (%p5146_p12), %s781_s29, 4294965232  ;;  %s5147_s25 = sld [smem:[#allocation34_spill]]  ;;  %s792_s8 = scalar_lea.vmem [#allocation23], %s4607_s16 }
 0x1e0   : > { %s5148_s14 = sld [smem:[#allocation39_spill]] }
 0x1e5   : > { %s885_s27 = sand.u32 1, %s5147_s25  }
 0x1e6   : > { %s4661_s13 = sshll.u32 %s885_s27, 3  ;;  %p2705_p2 = scmp.ne.s32.totalorder %s5148_s14, 0 }
 0x1e7   : > { %s887_s18 = scalar_lea.vmem [#allocation24], %s4661_s13  ;;  %v892_v0 = vld [vmem:[%s691_s2] sm:$0xff] (!%p2705_p2) }
 0x1e8   : > { %891 = sbr.rel (%p2705_p2) target bundleno = 495 (0x1ef), region = 128  ;;  %893 = vst [vmem:[#allocation2] sm:$0xff] (!%p2705_p2), %v892_v0 }
 0x1ef PF: > { %v4668_v1 = vld [vmem:[#allocation2] sm:$0xff]  ;;  %v3945_v2 = vmov 0.0   ;;  %v3946_v7 = vmov 0.0|0.0   ;;  %v931_v8 = vld [vmem:[%s4618_s10 + $0x18] sm:$0xff]  ;;  %v930_v9 = vld [vmem:[%s4618_s10 + $0x10] sm:$0xff]  ;;  %v895_v31 = vlaneseq  ;;  %vm3947_vm1 = vmmov 0  }
 0x1f0   : > { %902 = vadd.xlane.f32.xlu0 %v4668_v1  ;;  %1057 = vmatprep.mubr.f32.mxu0 %v3945_v2  ;;  %v929_v3 = vld [vmem:[%s4618_s10 + $0x8] sm:$0xff]  ;;  %v932_v4 = vld [vmem:[%s4618_s10 + $0x20] sm:$0xff]  ;;  %v935_v13 = vld [vmem:[%s4618_s10 + $0x38] sm:$0xff]  ;;  %vm1151_vm2 = vcmask 261120   ;;  %s3948_s7 = smov 96   ;;  %vm1228_vm3 = vcmask 64512  }
 0x1f1   : > { %v928_v5 = vld [vmem:[%s4618_s10] sm:$0xff]  ;;  %v3014_v6 = vpack.c.bf16 %v932_v4, %v929_v3  ;;  %3046 = vmatprep.subr.bf16.mxu1 %v3946_v7  ;;  %v933_v10 = vld [vmem:[%s4618_s10 + $0x28] sm:$0xff]  ;;  %v938_v14 = vld [vmem:[%s4618_s10 + $0x50] sm:$0xff]  ;;  %v896_v32 = vand.u32 127, %v895_v31  ;;  %2857 = vmatprep.mubr.msk.f32.mxu1 %vm3947_vm1, %v3945_v2  ;;  %s3949_s12 = smov 64   ;;  %s3950_s2 = smov 32  }
 0x1f2   : > { %v3016_v11 = vpack.c.bf16 %v931_v8, %v928_v5  ;;  %v3047_v12 = vpack.c.bf16 %v933_v10, %v930_v9  ;;  %v934_v15 = vld [vmem:[%s4618_s10 + $0x30] sm:$0xff]  ;;  %v3018_v16 = vpack.c.bf16 %v938_v14, %v935_v13  ;;  %v937_v17 = vld [vmem:[%s4618_s10 + $0x48] sm:$0xff]  ;;  %v936_v18 = vld [vmem:[%s4618_s10 + $0x40] sm:$0xff]  ;;  %s5149_s22 = scalar_lea.vmem [#allocation14], %s4607_s16  ;;  %s5153_s23 = sld [smem:[#allocation40_spill]] }
 0x1f3   : > { %3015 = vmatprep.subr.bf16.mxu0 %v3014_v6  ;;  %v939_v19 = vld [vmem:[%s4618_s10 + $0x58] sm:$0xff]  ;;  %v3020_v20 = vpack.c.bf16 %v937_v17, %v934_v15  ;;  %v941_v22 = vld [vmem:[%s4618_s10 + $0x68] sm:$0xff]  ;;  %v944_v23 = vld [vmem:[%s4618_s10 + $0x80] sm:$0xff]  ;;  %vm897_vm0 = vcmp.lt.s32.totalorder %v896_v32, 32  ;;  %s5155_s25 = sld [smem:[#allocation61_spill]]  ;;  %p5157_p0 = scmp.ne.s32.totalorder %s5115_s3, 0 }
 0x1f4   : > { %3017 = vmatpush1.bf16.msra.mxu0 %v3016_v11  ;;  %3048 = vmatpush3.bf16.msra.mxu1 %v3047_v12  ;;  %v3050_v21 = vpack.c.bf16 %v939_v19, %v936_v18  ;;  %v940_v24 = vld [vmem:[%s4618_s10 + $0x60] sm:$0xff]  ;;  %v3022_v25 = vpack.c.bf16 %v944_v23, %v941_v22  ;;  %v943_v26 = vld [vmem:[%s4618_s10 + $0x78] sm:$0xff]  ;;  %v942_v27 = vld [vmem:[%s4618_s10 + $0x70] sm:$0xff]  ;;  %v4696_v35 = vsel %vm897_vm0, 1.0, %v3945_v2 }
 0x1f5   : > { %3019 = vmatprep.subr.bf16.mxu0 %v3018_v16  ;;  %3049 = vmatprep.subr.bf16.mxu1 %v3946_v7  ;;  %v945_v28 = vld [vmem:[%s4618_s10 + $0x88] sm:$0xff]  ;;  %v3024_v29 = vpack.c.bf16 %v943_v26, %v940_v24  ;;  %v947_v39 = vld [vmem:[%s4618_s10 + $0x98] sm:$0xff]  ;;  %v950_v40 = vld [vmem:[%s4618_s10 + $0xb0] sm:$0xff] }
 0x1f6   : > { %v3053_v30 = vpack.c.bf16 %v945_v28, %v942_v27  ;;  %v3026_v41 = vpack.c.bf16 %v950_v40, %v947_v39  ;;  %v946_v42 = vld [vmem:[%s4618_s10 + $0x90] sm:$0xff]  ;;  %v949_v43 = vld [vmem:[%s4618_s10 + $0xa8] sm:$0xff]  ;;  %v948_v44 = vld [vmem:[%s4618_s10 + $0xa0] sm:$0xff] }
 0x1f7   : > { %v3028_v45 = vpack.c.bf16 %v949_v43, %v946_v42  ;;  %v951_v46 = vld [vmem:[%s4618_s10 + $0xb8] sm:$0xff]  ;;  %v953_v48 = vld [vmem:[%s4618_s10 + $0xc8] sm:$0xff]  ;;  %v956_v49 = vld [vmem:[%s4618_s10 + $0xe0] sm:$0xff] }
 0x1f8   : > { %3021 = vmatpush1.bf16.msra.mxu0 %v3020_v20  ;;  %3051 = vmatpush3.bf16.msra.mxu1 %v3050_v21  ;;  %v3056_v47 = vpack.c.bf16 %v951_v46, %v948_v44  ;;  %v3030_v50 = vpack.c.bf16 %v956_v49, %v953_v48  ;;  %v952_v51 = vld [vmem:[%s4618_s10 + $0xc0] sm:$0xff]  ;;  %v955_v52 = vld [vmem:[%s4618_s10 + $0xd8] sm:$0xff]  ;;  %v954_v53 = vld [vmem:[%s4618_s10 + $0xd0] sm:$0xff] }
 0x1f9   : > { %3023 = vmatprep.subr.bf16.mxu0 %v3022_v25  ;;  %3052 = vmatprep.subr.bf16.mxu1 %v3946_v7  ;;  %v3032_v54 = vpack.c.bf16 %v955_v52, %v952_v51  ;;  %v957_v55 = vld [vmem:[%s4618_s10 + $0xe8] sm:$0xff]  ;;  %v959_v56 = vld [vmem:[%s4618_s10 + $0xf8] sm:$0xff]  ;;  %v962_v57 = vld [vmem:[%s4618_s10 + $0x110] sm:$0xff] }
 0x1fa   : > { %v3059_v58 = vpack.c.bf16 %v957_v55, %v954_v53  ;;  %v3034_v59 = vpack.c.bf16 %v962_v57, %v959_v56  ;;  %v958_v60 = vld [vmem:[%s4618_s10 + $0xf0] sm:$0xff]  ;;  %v961_v61 = vld [vmem:[%s4618_s10 + $0x108] sm:$0xff]  ;;  %v960_v62 = vld [vmem:[%s4618_s10 + $0x100] sm:$0xff] }
 0x1fb   : > { %v3036_v63 = vpack.c.bf16 %v961_v61, %v958_v60  ;;  %v963_v0 = vld [vmem:[%s4618_s10 + $0x118] sm:$0xff]  ;;  %v965_v3 = vld [vmem:[%s4618_s10 + $0x128] sm:$0xff]  ;;  %v968_v4 = vld [vmem:[%s4618_s10 + $0x140] sm:$0xff] }
 0x1fc   : > { %3025 = vmatpush1.bf16.msra.mxu0 %v3024_v29  ;;  %3054 = vmatpush3.bf16.msra.mxu1 %v3053_v30  ;;  %v3062_v5 = vpack.c.bf16 %v963_v0, %v960_v62  ;;  %v3038_v6 = vpack.c.bf16 %v968_v4, %v965_v3  ;;  %v964_v8 = vld [vmem:[%s4618_s10 + $0x120] sm:$0xff]  ;;  %v967_v9 = vld [vmem:[%s4618_s10 + $0x138] sm:$0xff]  ;;  %v966_v10 = vld [vmem:[%s4618_s10 + $0x130] sm:$0xff] }
 0x1fd   : > { %3055 = vmatprep.subr.bf16.mxu1 %v3946_v7  ;;  %3027 = vmatprep.subr.bf16.mxu0 %v3026_v41  ;;  %v969_v11 = vld [vmem:[%s4618_s10 + $0x148] sm:$0xff]  ;;  %v971_v12 = vld [vmem:[%s4618_s10 + $0x158] sm:$0xff]  ;;  %v974_v13 = vld [vmem:[%s4618_s10 + $0x170] sm:$0xff]  ;;  %v3040_v14 = vpack.c.bf16 %v967_v9, %v964_v8 }
 0x1fe   : > { %v3065_v15 = vpack.c.bf16 %v969_v11, %v966_v10  ;;  %v3042_v16 = vpack.c.bf16 %v974_v13, %v971_v12  ;;  %v970_v17 = vld [vmem:[%s4618_s10 + $0x150] sm:$0xff]  ;;  %v973_v18 = vld [vmem:[%s4618_s10 + $0x168] sm:$0xff]  ;;  %v972_v19 = vld [vmem:[%s4618_s10 + $0x160] sm:$0xff] }
 0x1ff   : > { %v975_v20 = vld [vmem:[%s4618_s10 + $0x178] sm:$0xff]  ;;  %v3044_v21 = vpack.c.bf16 %v973_v18, %v970_v17  ;;  %v2707_v27 = vld [vmem:[%s699_s28] ss:$0 sm:$0xff]  ;;  %v1139_v9 = vld [vmem:[%s4629_s20 + $0x20] sm:$0xff]  ;;  %s5150_s28 = scalar_lea.vmem [#allocation15], %s4607_s16  ;;  %s5152_s10 = sld [smem:[#allocation39_spill]] }
 0x200   : > { %3029 = vmatpush1.bf16.msra.mxu0 %v3028_v45  ;;  %3057 = vmatpush3.bf16.msra.mxu1 %v3056_v47  ;;  %v3068_v22 = vpack.c.bf16 %v975_v20, %v972_v19  ;;  %v2708_v29 = vld [vmem:[%s707_s26] ss:$0 sm:$0xff]  ;;  %v1140_v10 = vld [vmem:[%s4629_s20 + $0x28] sm:$0xff]  ;;  %v1141_v11 = vld [vmem:[%s4629_s20 + $0x30] sm:$0xff]  ;;  %s5151_s26 = scalar_lea.vmem [#allocation17], %s4607_s16  ;;  %s2340_s16 = scalar_lea.sflag [#allocation5], %s885_s27 }
 0x201   : > { %3058 = vmatprep.subr.bf16.mxu1 %v3946_v7  ;;  %3031 = vmatprep.subr.bf16.mxu0 %v3030_v50  ;;  %v3071_v12 = vpack.c.bf16 %v1140_v10, %v1139_v9  ;;  %v1142_v13 = vld [vmem:[%s4629_s20 + $0x38] sm:$0xff]  ;;  %v1135_v17 = vld [vmem:[%s4629_s20] sm:$0xff]  ;;  %v1136_v18 = vld [vmem:[%s4629_s20 + $0x8] sm:$0xff] }
 0x202   : > { %v3077_v20 = vpack.c.bf16 %v1136_v18, %v1135_v17  ;;  %v1148_v9 = vld [vmem:[%s4629_s20 + $0x68] sm:$0xff]  ;;  %v1149_v10 = vld [vmem:[%s4629_s20 + $0x70] sm:$0xff] }
 0x204   : > { %3033 = vmatpush1.bf16.msra.mxu0 %v3032_v54  ;;  %3060 = vmatpush3.bf16.msra.mxu1 %v3059_v58 }
 0x205   : > { %3035 = vmatprep.subr.bf16.mxu0 %v3034_v59  ;;  %3061 = vmatprep.subr.bf16.mxu1 %v3946_v7 }
 0x208   : > { %3037 = vmatpush1.bf16.msra.mxu0 %v3036_v63  ;;  %3063 = vmatpush3.bf16.msra.mxu1 %v3062_v5 }
 0x209   : > { %3039 = vmatprep.subr.bf16.mxu0 %v3038_v6  ;;  %3064 = vmatprep.subr.bf16.mxu1 %v3946_v7 }
 0x20c   : > { %3041 = vmatpush1.bf16.msra.mxu0 %v3040_v14  ;;  %3066 = vmatpush3.bf16.msra.mxu1 %v3065_v15  ;;  %v3074_v14 = vpack.c.bf16 %v1142_v13, %v1141_v11 }
 0x20d   : > { %3043 = vmatprep.subr.bf16.mxu0 %v3042_v16  ;;  %3067 = vmatprep.subr.bf16.mxu1 %v3946_v7 }
 0x210   : > { %3045 = vmatpush1.bf16.msra.mxu0 %v3044_v21  ;;  %3069 = vmatpush3.bf16.msra.mxu1 %v3068_v22  ;;  %v1137_v22 = vld [vmem:[%s4629_s20 + $0x10] sm:$0xff] }
 0x211   : > { %2870 = vmatprep.subr.mxu0 %v3945_v2  ;;  %2860 = vmatprep.subr.mxu1 %v3945_v2 }
 0x27d   : > { %v903_v33 = vpop.xlane.xlu0 %902 }
 0x27e   : > { %v904_v34 = vmul.f32 0.03125, %v903_v33  ;;  %v979_v33 = vshrl.u32 %v895_v31, 7 }
 0x280   : > { %v905_v36 = vsub.f32 %v4668_v1, %v904_v34  ;;  %v980_v34 = vsub.s32 0, %v979_v33  ;;  %v988_v40 = vsub.s32 2, %v979_v33 }
 0x282   : > { %v4700_v37 = vmul.f32 %v4696_v35, %v905_v36  ;;  %v976_v36 = vld [vmem:[%s4626_s24] sm:$0x7] }
 0x283   : > { %v981_v39 = vrot.slane %v976_v36, %v980_v34  ;;  %v989_v46 = vrot.slane %v976_v36, %v988_v40 }
 0x284   : > { %v907_v38 = vmul.f32 %v4700_v37, %v4700_v37 }
 0x286   : > { %908 = vadd.xlane.f32.xlu0 %v907_v38  ;;  %v984_v38 = vsub.s32 1, %v979_v33 }
 0x313   : > { %v909_v23 = vpop.xlane.xlu0 %908 }
 0x314   : > { %v910_v24 = vmul.f32 0.03125, %v909_v23  ;;  %v1138_v23 = vld [vmem:[%s4629_s20 + $0x18] sm:$0xff] }
 0x316   : > { %v911_v25 = vadd.f32 1e-05, %v910_v24  ;;  %v3080_v24 = vpack.c.bf16 %v1138_v23, %v1137_v22 }
 0x318   : > { %3344 = vrsqrt.f32 %v911_v25 }
 0x322   : > { %v3345_v26 = vpop.eup %3344 }
 0x323   : > { %v913_v28 = vmul.f32 %v3345_v26, %v4700_v37  ;;  %v985_v37 = vrot.slane %v976_v36, %v984_v38 }
 0x325   : > { %v920_v30 = vmul.f32 %v2707_v27, %v913_v28 }
 0x327   : > { %v927_v32 = vadd.f32 %v2708_v29, %v920_v30 }
 0x329   : > { %1058 = vmatmul.mubr.f32.vlgmr.msra.gmra.mrb[0].mxu0 %v927_v32  ;;  %2858 = vmatmul.mubr.f32.vlgmr.msra.gmra.mrb[0].mxu1 %v927_v32 }
 0x32a   : > { %2862 = vmatprep.mubr.msk.f32.mxu1 %vm3947_vm1, %v3945_v2  ;;  %2872 = vmatprep.mubr.msk.f32.mxu0 %vm3947_vm1, %v3945_v2 }
 0x3fc   : > { %v1059_v41 = vpop.f32.mrb[0].mxu0  ;;  %v1130_v42 = vpop.f32.mrb[0].mxu1 }
 0x3fd   : > { %v1060_v43 = vadd.f32 %v1059_v41, %v981_v39  ;;  %v1061_v44 = vpop.f32.mrb[1].mxu0  ;;  %v2859_v45 = vpop.f32.mrb[1].mxu1  ;;  %v4762_v48 = vadd.f32 %v1130_v42, %v989_v46 }
 0x3fe   : > { %v4753_v47 = vadd.f32 %v1061_v44, %v985_v37 }
 0x3ff   : > { %v4759_v31 = vmul.f32 0.35355338, %v1060_v43 }
 0x400   : > { %1315 = vrot.lane.b32.xlu1 %v4753_v47, %s3948_s7  ;;  %2861 = vmatpush3.xpose.msk.msra.mxu1 %vm1151_vm2, %v4753_v47 }
 0x401   : > { %2865 = vmatprep.subr.mxu1 %v3945_v2 }
 0x403   : > { %2863 = vmatmul.mubr.msk.f32.vlgmr.msra.gmra.mrb[2].mxu1 %vm1151_vm2, %v4759_v31 }
 0x404   : > { %1313 = vrot.lane.b32.xlu1 %v4759_v31, %s3948_s7  ;;  %2866 = vmatpush3.msra.mxu1 %v4762_v48 }
 0x405   : > { %2867 = vmatprep.mubr.msk.f32.mxu1 %vm3947_vm1, %v3945_v2  ;;  %2875 = vmatprep.subr.mxu1 %v3945_v2 }
 0x472   : > { %v1316_v49 = vpop.permute.xlu1 %1315 }
 0x473   : > { %2871 = vmatpush3.xpose.msk.msra.mxu0 %vm1151_vm2, %v1316_v49  ;;  %v1143_v49 = vld [vmem:[%s4629_s20 + $0x40] sm:$0xff] }
 0x474   : > { %3070 = vmatprep.subr.bf16.mxu0 %v3946_v7 }
 0x476   : > { %v1314_v50 = vpop.permute.xlu1 %1313 }
 0x477   : > { %2873 = vmatmul.mubr.msk.f32.vlgmr.msra.gmra.mrb[2].mxu0 %vm1151_vm2, %v1314_v50  ;;  %v1144_v50 = vld [vmem:[%s4629_s20 + $0x48] sm:$0xff] }
 0x478   : > { %2888 = vmatprep.mubr.msk.f32.mxu0 %vm3947_vm1, %v3945_v2  ;;  %3072 = vmatpush3.bf16.msra.mxu0 %v3071_v12  ;;  %v1150_v12 = vld [vmem:[%s4629_s20 + $0x78] sm:$0xff] }
 0x479   : > { %3073 = vmatprep.subr.bf16.mxu0 %v3946_v7  ;;  %v3092_v13 = vpack.c.bf16 %v1150_v12, %v1149_v10  ;;  %v2247_v10 = vld [vmem:[%s4652_s6 + $0x28] sm:$0xff]  ;;  %v2248_v12 = vld [vmem:[%s4652_s6 + $0x30] sm:$0xff] }
 0x47c   : > { %3075 = vmatpush3.bf16.msra.mxu0 %v3074_v14 }
 0x47d   : > { %2902 = vmatprep.subr.mxu0 %v3945_v2 }
 0x4d6   : > { %v1224_v51 = vpop.f32.mrb[2].mxu1 }
 0x4d7   : > { %v2864_v52 = vpop.f32.mrb[3].mxu1  ;;  %v1229_v53 = vsel %vm1228_vm3, %v1224_v51, -inf }
 0x4d8   : > { %1230 = vmax.xlane.f32.xlu0 %v1229_v53  ;;  %v1146_v52 = vld [vmem:[%s4629_s20 + $0x58] sm:$0xff] }
 0x54a   : > { %v1387_v54 = vpop.f32.mrb[2].mxu0 }
 0x54b   : > { %v2874_v55 = vpop.f32.mrb[3].mxu0  ;;  %v1391_v56 = vsel %vm1228_vm3, %v1387_v54, -inf }
 0x54c   : > { %1392 = vmax.xlane.f32.xlu1 %v1391_v56 }
 0x55d   : > { %1625 = vrot.lane.b32.xlu1 %v4759_v31, %s3949_s12 }
 0x565   : > { %v1231_v57 = vpop.xlane.xlu0 %1230 }
 0x566   : > { %v1232_v58 = vsub.f32 %v1224_v51, %v1231_v57  ;;  %v1145_v51 = vld [vmem:[%s4629_s20 + $0x50] sm:$0xff] }
 0x567   : > { %v3086_v53 = vpack.c.bf16 %v1146_v52, %v1145_v51  ;;  %v2152_v51 = vld [vmem:[%s4644_s30 + $0x60] sm:$0xff] }
 0x568   : > { %v1233_v59 = vmul.f32 1.442695, %v1232_v58 }
 0x56a   : > { %3346 = vpow2.f32 %v1233_v59 }
 0x574   : > { %v3347_v60 = vpop.eup %3346 }
 0x575   : > { %v1235_v61 = vsel %vm1228_vm3, %v3347_v60, 0.0 }
 0x576   : > { %1236 = vadd.xlane.f32.xlu0 %v1235_v61 }
 0x5d9   : > { %v1393_v62 = vpop.xlane.xlu1 %1392 }
 0x5da   : > { %v1394_v63 = vsub.f32 %v1387_v54, %v1393_v62 }
 0x5dc   : > { %v1395_v0 = vmul.f32 1.442695, %v1394_v63 }
 0x5dd   : > { %v1626_v30 = vpop.permute.xlu1 %1625 }
 0x5de   : > { %3348 = vpow2.f32 %v1395_v0 }
 0x5e8   : > { %v3349_v3 = vpop.eup %3348 }
 0x5e9   : > { %v1397_v4 = vsel %vm1228_vm3, %v3349_v3, 0.0 }
 0x5ea   : > { %1398 = vadd.xlane.f32.xlu0 %v1397_v4 }
 0x600   : > { %1403 = vrot.lane.b32.xlu0 %v4762_v48, %s3948_s7  ;;  %s5156_s7 = smov %s5155_s25 }
 0x603   : > { %v1237_v5 = vpop.xlane.xlu0 %1236 }
 0x604   : > { %3350 = vrcp.f32 %v1237_v5  ;;  %1627 = vrot.lane.b32.xlu0 %v4753_v47, %s3949_s12 }
 0x60e   : > { %v3351_v6 = vpop.eup %3350 }
 0x60f   : > { %v1239_v8 = vmul.f32 %v3351_v6, %v3347_v60 }
 0x611   : > { %2868 = vmatmul.mubr.msk.f32.vlgmr.msra.gmra.mrb[4].mxu1 %vm1228_vm3, %v1239_v8  ;;  %v1147_v8 = vld [vmem:[%s4629_s20 + $0x60] sm:$0xff]  ;;  %s2731_s20 = sshll.u32 %s5152_s10, 1 }
 0x612   : > { %2877 = vmatprep.mubr.msk.f32.mxu1 %vm3947_vm1, %v3945_v2  ;;  %v3089_v11 = vpack.c.bf16 %v1148_v9, %v1147_v8  ;;  %v2246_v9 = vld [vmem:[%s4652_s6 + $0x20] sm:$0xff]  ;;  %s2351_s14 = sadd.s32 %s5153_s23, %s2731_s20 }
 0x677   : > { %v1399_v15 = vpop.xlane.xlu0 %1398 }
 0x678   : > { %3352 = vrcp.f32 %v1399_v15 }
 0x67b   : > { %v1404_v16 = vpop.permute.xlu0 %1403 }
 0x67c   : > { %2876 = vmatpush3.msra.mxu1 %v1404_v16 }
 0x67d   : > { %3076 = vmatprep.subr.bf16.mxu1 %v3946_v7 }
 0x67f   : > { %v1628_v28 = vpop.permute.xlu0 %1627 }
 0x682   : > { %v3353_v19 = vpop.eup %3352 }
 0x683   : > { %v1401_v21 = vmul.f32 %v3353_v19, %v3349_v3 }
 0x685   : > { %2878 = vmatmul.mubr.msk.f32.vlgmr.msra.gmra.mrb[6].mxu1 %vm1228_vm3, %v1401_v21 }
 0x686   : > { %3078 = vmatpush3.bf16.msra.mxu1 %v3077_v20  ;;  %2899 = vmatprep.mubr.msk.f32.mxu1 %vm3947_vm1, %v3945_v2 }
 0x687   : > { %3079 = vmatprep.subr.bf16.mxu1 %v3946_v7 }
 0x68a   : > { %3081 = vmatpush3.bf16.msra.mxu1 %v3080_v24  ;;  %v2725_v24 = vld [vmem:[%s5149_s22] ss:$0 sm:$0xff] }
 0x68b   : > { %2907 = vmatprep.subr.mxu1 %v3945_v2 }
 0x6e4   : > { %v1309_v25 = vpop.f32.mrb[4].mxu1 }
 0x6e5   : > { %v2869_v26 = vpop.f32.mrb[5].mxu1  ;;  %2900 = vmatmul.mubr.msk.f32.vlgmr.msra.gmra.mrb[8].mxu1 %vm1151_vm2, %v1309_v25 }
 0x6e6   : > { %2909 = vmatprep.mubr.msk.f32.mxu1 %vm3947_vm1, %v3945_v2 }
 0x758   : > { %v1475_v27 = vpop.f32.mrb[6].mxu1 }
 0x759   : > { %v2879_v29 = vpop.f32.mrb[7].mxu1  ;;  %2889 = vmatmul.mubr.msk.f32.vlgmr.msra.gmra.mrb[4].mxu0 %vm1151_vm2, %v1475_v27  ;;  %v2140_v27 = vld [vmem:[%s4644_s30] sm:$0xff] }
 0x75a   : > { %2903 = vmatpush3.xpose.msk.msra.mxu0 %vm1151_vm2, %v1628_v28  ;;  %2904 = vmatprep.mubr.msk.f32.mxu0 %vm3947_vm1, %v3945_v2  ;;  %v2141_v28 = vld [vmem:[%s4644_s30 + $0x8] sm:$0xff]  ;;  %v2142_v29 = vld [vmem:[%s4644_s30 + $0x10] sm:$0xff] }
 0x75b   : > { %3082 = vmatprep.subr.bf16.mxu0 %v3946_v7 }
 0x75d   : > { %2905 = vmatmul.mubr.msk.f32.vlgmr.msra.gmra.mrb[6].mxu0 %vm1151_vm2, %v1626_v30  ;;  %v3095_v30 = vpack.c.bf16 %v2141_v28, %v2140_v27  ;;  %v2728_v27 = vld [vmem:[%s775_s17] ss:$0 sm:$0xff]  ;;  %s2355_s17 = sshll.u32 %s887_s18, 4  ;;  %s4935_s17 = int_to_ptr.vmem [resolvable:$true] %s2355_s17 }
 0x75e   : > { %2920 = vmatprep.mubr.msk.f32.mxu0 %vm3947_vm1, %v3945_v2 }
 0x7b8   : > { %v1621_v32 = vpop.f32.mrb[8].mxu1 }
 0x7b9   : > { %v2901_v33 = vpop.f32.mrb[9].mxu1 }
 0x7ba   : > { %v2144_v33 = vld [vmem:[%s4644_s30 + $0x20] sm:$0xff] }
 0x82c   : > { %v1548_v34 = vpop.f32.mrb[4].mxu0 }
 0x82d   : > { %v4817_v36 = vadd.f32 %v1621_v32, %v1548_v34  ;;  %v2890_v38 = vpop.f32.mrb[5].mxu0  ;;  %v2143_v32 = vld [vmem:[%s4644_s30 + $0x18] sm:$0xff]  ;;  %v2145_v34 = vld [vmem:[%s4644_s30 + $0x28] sm:$0xff] }
 0x830   : > { %v1699_v39 = vpop.f32.mrb[6].mxu0 }
 0x831   : > { %v2906_v40 = vpop.f32.mrb[7].mxu0  ;;  %v1703_v37 = vsel %vm1228_vm3, %v1699_v39, -inf }
 0x832   : > { %1704 = vmax.xlane.f32.xlu0 %v1703_v37 }
 0x848   : > { %1714 = vrot.lane.b32.xlu0 %v4762_v48, %s3949_s12 }
 0x84c   : > { %1864 = vrot.lane.b32.xlu0 %v4759_v31, %s3950_s2  ;;  %v3083_v31 = vpack.c.bf16 %v1144_v50, %v1143_v49  ;;  %v2151_v50 = vld [vmem:[%s4644_s30 + $0x58] sm:$0xff] }
 0x84e   : > { %3084 = vmatpush3.bf16.msra.mxu0 %v3083_v31  ;;  %v2153_v31 = vld [vmem:[%s4644_s30 + $0x68] sm:$0xff] }
 0x84f   : > { %3085 = vmatprep.subr.bf16.mxu0 %v3946_v7  ;;  %v3113_v52 = vpack.c.bf16 %v2153_v31, %v2152_v51 }
 0x852   : > { %3087 = vmatpush3.bf16.msra.mxu0 %v3086_v53  ;;  %v2154_v53 = vld [vmem:[%s4644_s30 + $0x70] sm:$0xff] }
 0x853   : > { %3088 = vmatprep.subr.bf16.mxu0 %v3946_v7 }
 0x8bf   : > { %v1705_v41 = vpop.xlane.xlu0 %1704 }
 0x8c0   : > { %v1706_v42 = vsub.f32 %v1699_v39, %v1705_v41  ;;  %v2146_v41 = vld [vmem:[%s4644_s30 + $0x30] sm:$0xff] }
 0x8c2   : > { %v1707_v43 = vmul.f32 1.442695, %v1706_v42  ;;  %v2147_v42 = vld [vmem:[%s4644_s30 + $0x38] sm:$0xff] }
 0x8c3   : > { %v1715_v44 = vpop.permute.xlu0 %1714 }
 0x8c4   : > { %3354 = vpow2.f32 %v1707_v43  ;;  %2908 = vmatpush3.msra.mxu1 %v1715_v44  ;;  %v3104_v43 = vpack.c.bf16 %v2147_v42, %v2146_v41  ;;  %v2148_v44 = vld [vmem:[%s4644_s30 + $0x40] sm:$0xff] }
 0x8c5   : > { %2923 = vmatprep.subr.mxu1 %v3945_v2 }
 0x8ce   : > { %v3355_v45 = vpop.eup %3354 }
 0x8cf   : > { %v1709_v46 = vsel %vm1228_vm3, %v3355_v45, 0.0 }
 0x8d0   : > { %1710 = vadd.xlane.f32.xlu1 %v1709_v46  ;;  %v2150_v46 = vld [vmem:[%s4644_s30 + $0x50] sm:$0xff] }
 0x8e1   : > { %1866 = vrot.lane.b32.xlu1 %v4753_v47, %s3950_s2  ;;  %v1865_v47 = vpop.permute.xlu0 %1864 }
 0x95d   : > { %v1711_v54 = vpop.xlane.xlu1 %1710 }
 0x95e   : > { %3356 = vrcp.f32 %v1711_v54  ;;  %v2155_v54 = vld [vmem:[%s4644_s30 + $0x78] sm:$0xff] }
 0x961   : > { %v1867_v57 = vpop.permute.xlu1 %1866 }
 0x968   : > { %v3357_v55 = vpop.eup %3356 }
 0x969   : > { %v1713_v56 = vmul.f32 %v3357_v55, %v3355_v45  ;;  %v2149_v45 = vld [vmem:[%s4644_s30 + $0x48] sm:$0xff]  ;;  %v3116_v55 = vpack.c.bf16 %v2155_v54, %v2154_v53  ;;  %s2732_s30 = sshll.u32 %s2351_s14, 7 }
 0x96a   : > { %v3107_v49 = vpack.c.bf16 %v2149_v45, %v2148_v44  ;;  %s4933_s12 = scalar_lea.hbm %s5155_s25, %s2732_s30 }
 0x96b   : > { %2910 = vmatmul.mubr.msk.f32.vlgmr.msra.gmra.mrb[10].mxu1 %vm1228_vm3, %v1713_v56  ;;  %v2242_v56 = vld [vmem:[%s4652_s6] sm:$0xff] }
 0x96c   : > { %2924 = vmatpush3.xpose.msk.msra.mxu1 %vm1151_vm2, %v1867_v57  ;;  %2925 = vmatprep.mubr.msk.f32.mxu1 %vm3947_vm1, %v3945_v2  ;;  %v2243_v57 = vld [vmem:[%s4652_s6 + $0x8] sm:$0xff] }
 0x96d   : > { %2928 = vmatprep.subr.mxu1 %v3945_v2 }
 0x96f   : > { %2926 = vmatmul.mubr.msk.f32.vlgmr.msra.gmra.mrb[12].mxu1 %vm1151_vm2, %v1865_v47  ;;  %v3119_v47 = vpack.c.bf16 %v2243_v57, %v2242_v56 }
 0x970   : > { %2930 = vmatprep.mubr.msk.f32.mxu1 %vm3947_vm1, %v3945_v2 }
 0xa3e   : > { %v1786_v58 = vpop.f32.mrb[10].mxu1 }
 0xa3f   : > { %v2911_v59 = vpop.f32.mrb[11].mxu1  ;;  %2921 = vmatmul.mubr.msk.f32.vlgmr.msra.gmra.mrb[8].mxu0 %vm1151_vm2, %v1786_v58 }
 0xa40   : > { %2941 = vmatprep.mubr.msk.f32.mxu0 %vm3947_vm1, %v3945_v2  ;;  %3090 = vmatpush3.bf16.msra.mxu0 %v3089_v11  ;;  %v3125_v11 = vpack.c.bf16 %v2247_v10, %v2246_v9 }
 0xa41   : > { %3091 = vmatprep.subr.bf16.mxu0 %v3946_v7 }
 0xa42   : > { %v1938_v60 = vpop.f32.mrb[12].mxu1 }
 0xa43   : > { %v2927_v61 = vpop.f32.mrb[13].mxu1  ;;  %v1942_v62 = vsel %vm1228_vm3, %v1938_v60, -inf }
 0xa44   : > { %1943 = vmax.xlane.f32.xlu0 %v1942_v62  ;;  %3093 = vmatpush3.bf16.msra.mxu0 %v3092_v13  ;;  %v2726_v62 = vld [vmem:[%s5150_s28] ss:$0 sm:$0xff]  ;;  %v2249_v13 = vld [vmem:[%s4652_s6 + $0x38] sm:$0xff] }
 0xa45   : > { %3118 = vmatprep.subr.bf16.mxu0 %v3946_v7 }
 0xa5a   : > { %1953 = vrot.lane.b32.xlu0 %v4762_v48, %s3950_s2  ;;  %s3951_s2 = smov [#allocation24]  }
 0xa5b   : > { %s3760_s22 = sshll.u32 %s3951_s2, 4  ;;  %s3761_s22 = int_to_ptr.vmem [resolvable:$false] %s3760_s22 }
 0xa5c   : > { %s3762_s28 = scalar_lea.vmem %s3761_s22, 256  ;;  %p3763_p1 = scmp.lt.s32.totalorder %s4935_s17, %s3761_s22 }
 0xad1   : > { %v1944_v63 = vpop.xlane.xlu0 %1943 }
 0xad2   : > { %v1945_v0 = vsub.f32 %v1938_v60, %v1944_v63 }
 0xad4   : > { %v1946_v3 = vmul.f32 1.442695, %v1945_v0  ;;  %v2727_v0 = vld [vmem:[%s5151_s26] ss:$0 sm:$0xff] }
 0xad5   : > { %v1954_v4 = vpop.permute.xlu0 %1953 }
 0xad6   : > { %3358 = vpow2.f32 %v1946_v3  ;;  %2929 = vmatpush3.msra.mxu1 %v1954_v4 }
 0xad7   : > { %3094 = vmatprep.subr.bf16.mxu1 %v3946_v7 }
 0xae0   : > { %v3359_v5 = vpop.eup %3358 }
 0xae1   : > { %v1948_v6 = vsel %vm1228_vm3, %v3359_v5, 0.0 }
 0xae2   : > { %1949 = vadd.xlane.f32.xlu1 %v1948_v6  ;;  %v2245_v6 = vld [vmem:[%s4652_s6 + $0x18] sm:$0xff] }
 0xb12   : > { %v1859_v48 = vpop.f32.mrb[8].mxu0 }
 0xb13   : > { %v1863_v14 = vadd.f32 %v1859_v48, %v4817_v36  ;;  %v2922_v15 = vpop.f32.mrb[9].mxu0  ;;  %v3128_v48 = vpack.c.bf16 %v2249_v13, %v2248_v12 }
 0xb14   : > { %v2251_v15 = vld [vmem:[%s4652_s6 + $0x48] sm:$0xff] }
 0xb6f   : > { %v1950_v16 = vpop.xlane.xlu1 %1949 }
 0xb70   : > { %3360 = vrcp.f32 %v1950_v16 }
 0xb7a   : > { %v3361_v17 = vpop.eup %3360 }
 0xb7b   : > { %v1952_v18 = vmul.f32 %v3361_v17, %v3359_v5  ;;  %v2244_v5 = vld [vmem:[%s4652_s6 + $0x10] sm:$0xff] }
 0xb7c   : > { %v3122_v8 = vpack.c.bf16 %v2245_v6, %v2244_v5  ;;  %v2252_v17 = vld [vmem:[%s4652_s6 + $0x50] sm:$0xff] }
 0xb7d   : > { %2931 = vmatmul.mubr.msk.f32.vlgmr.msra.gmra.mrb[14].mxu1 %vm1228_vm3, %v1952_v18  ;;  %v2253_v18 = vld [vmem:[%s4652_s6 + $0x58] sm:$0xff] }
 0xb7e   : > { %2976 = vmatprep.mubr.msk.f32.mxu1 %vm3947_vm1, %v3945_v2  ;;  %3096 = vmatpush3.bf16.msra.mxu1 %v3095_v30 }
 0xb7f   : > { %3097 = vmatprep.subr.bf16.mxu1 %v3946_v7 }
 0xc50   : > { %v2025_v19 = vpop.f32.mrb[14].mxu1 }
 0xc51   : > { %v2932_v20 = vpop.f32.mrb[15].mxu1  ;;  %2942 = vmatmul.mubr.msk.f32.vlgmr.msra.gmra.mrb[10].mxu0 %vm1151_vm2, %v2025_v19  ;;  %v3134_v19 = vpack.c.bf16 %v2253_v18, %v2252_v17 }
 0xc52   : > { %3011 = vmatprep.mubr.msk.f32.mxu0 %vm3947_vm1, %v3945_v2  ;;  %v3098_v2 = vpack.c.bf16 %v2143_v32, %v2142_v29  ;;  %3120 = vmatpush3.bf16.msra.mxu0 %v3119_v47  ;;  %v2254_v20 = vld [vmem:[%s4652_s6 + $0x60] sm:$0xff] }
 0xc53   : > { %3121 = vmatprep.subr.bf16.mxu0 %v3946_v7 }
 0xc54   : > { %3099 = vmatpush3.bf16.msra.mxu1 %v3098_v2 }
 0xc55   : > { %3100 = vmatprep.subr.bf16.mxu1 %v3946_v7 }
 0xc56   : > { %3123 = vmatpush3.bf16.msra.mxu0 %v3122_v8 }
 0xc57   : > { %3124 = vmatprep.subr.bf16.mxu0 %v3946_v7 }
 0xc5a   : > { %3126 = vmatpush3.bf16.msra.mxu0 %v3125_v11 }
 0xc5b   : > { %3127 = vmatprep.subr.bf16.mxu0 %v3946_v7 }
 0xc5e   : > { %3129 = vmatpush3.bf16.msra.mxu0 %v3128_v48 }
 0xc5f   : > { %3130 = vmatprep.subr.bf16.mxu0 %v3946_v7 }
 0xd24   : > { %v2098_v21 = vpop.f32.mrb[10].mxu0 }
 0xd25   : > { %v2102_v22 = vadd.f32 %v2098_v21, %v1863_v14  ;;  %v2943_v23 = vpop.f32.mrb[11].mxu0  ;;  %v2250_v14 = vld [vmem:[%s4652_s6 + $0x40] sm:$0xff]  ;;  %v2255_v21 = vld [vmem:[%s4652_s6 + $0x68] sm:$0xff] }
 0xd26   : > { %v3131_v16 = vpack.c.bf16 %v2251_v15, %v2250_v14  ;;  %v2256_v23 = vld [vmem:[%s4652_s6 + $0x70] sm:$0xff] }
 0xd27   : > { %v2103_v25 = vadd.f32 %v2102_v22, %v4668_v1  ;;  %v3101_v1 = vpack.c.bf16 %v2145_v34, %v2144_v33  ;;  %v3137_v22 = vpack.c.bf16 %v2255_v21, %v2254_v20 }
 0xd28   : > { %3132 = vmatpush3.bf16.msra.mxu0 %v3131_v16 }
 0xd29   : > { %v4866_v26 = vadd.f32 %v2725_v24, %v2103_v25  ;;  %3102 = vmatpush3.bf16.msra.mxu1 %v3101_v1  ;;  %3133 = vmatprep.subr.bf16.mxu0 %v3946_v7  ;;  %v2257_v24 = vld [vmem:[%s4652_s6 + $0x78] sm:$0xff] }
 0xd2a   : > { %3103 = vmatprep.subr.bf16.mxu1 %v3946_v7  ;;  %v3140_v25 = vpack.c.bf16 %v2257_v24, %v2256_v23 }
 0xd2b   : > { %2114 = vadd.xlane.f32.xlu1 %v4866_v26 }
 0xd2c   : > { %3135 = vmatpush3.bf16.msra.mxu0 %v3134_v19 }
 0xd2d   : > { %3105 = vmatpush3.bf16.msra.mxu1 %v3104_v43  ;;  %3136 = vmatprep.subr.bf16.mxu0 %v3946_v7 }
 0xd2e   : > { %3106 = vmatprep.subr.bf16.mxu1 %v3946_v7 }
 0xd30   : > { %3138 = vmatpush3.bf16.msra.mxu0 %v3137_v22 }
 0xd31   : > { %3108 = vmatpush3.bf16.msra.mxu1 %v3107_v49  ;;  %3139 = vmatprep.subr.bf16.mxu0 %v3946_v7 }
 0xd32   : > { %3109 = vmatprep.subr.bf16.mxu1 %v3946_v7 }
 0xd34   : > { %3141 = vmatpush3.bf16.msra.mxu0 %v3140_v25 }
 0xdb8   : > { %v2115_v36 = vpop.xlane.xlu1 %2114 }
 0xdb9   : > { %v2116_v38 = vmul.f32 0.03125, %v2115_v36 }
 0xdbb   : > { %v2117_v39 = vsub.f32 %v4866_v26, %v2116_v38 }
 0xdbd   : > { %v2118_v40 = vmul.f32 %v4696_v35, %v2117_v39  ;;  %v3110_v35 = vpack.c.bf16 %v2151_v50, %v2150_v46 }
 0xdbf   : > { %v2119_v37 = vmul.f32 %v2118_v40, %v2118_v40  ;;  %3111 = vmatpush3.bf16.msra.mxu1 %v3110_v35 }
 0xdc0   : > { %3112 = vmatprep.subr.bf16.mxu1 %v3946_v7 }
 0xdc1   : > { %2120 = vadd.xlane.f32.xlu1 %v2119_v37  ;;  %v2729_v37 = vld [vmem:[%s792_s8] ss:$0 sm:$0xff]  ;;  %s3756_s8 = scalar_lea.vmem %s4935_s17, 128 }
 0xdc2   : > { %p3757_p9 = scmp.ne.s32.totalorder %s4935_s17, %s3756_s8  ;;  %p3764_p3 = scmp.lt.s32.totalorder %s3762_s28, %s3756_s8 }
 0xdc3   : > { %3114 = vmatpush3.bf16.msra.mxu1 %v3113_v52 }
 0xdc4   : > { %3115 = vmatprep.subr.bf16.mxu1 %v3946_v7  ;;  %p3758_p10 = pnand %p3757_p9, %p5157_p0  ;;  %p3765_p11 = por %p3764_p3, %p3763_p1 }
 0xdc6   : > { %p3759_p4 = pneg %p3758_p10 }
 0xdc7   : > { %3117 = vmatpush3.bf16.msra.mxu1 %v3116_v55 }
 0xdc8   : > { %p3766_p5 = pnand %p3765_p11, %p3759_p4 }
 0xe4e   : > { %v2121_v58 = vpop.xlane.xlu1 %2120 }
 0xe4f   : > { %v2122_v59 = vmul.f32 0.03125, %v2121_v58 }
 0xe51   : > { %v2123_v60 = vadd.f32 1e-05, %v2122_v59 }
 0xe53   : > { %3362 = vrsqrt.f32 %v2123_v60 }
 0xe5d   : > { %v3363_v61 = vpop.eup %3362 }
 0xe5e   : > { %v2125_v63 = vmul.f32 %v3363_v61, %v2118_v40 }
 0xe60   : > { %v2132_v3 = vmul.f32 %v2726_v62, %v2125_v63 }
 0xe62   : > { %v2139_v4 = vadd.f32 %v2727_v0, %v2132_v3 }
 0xe64   : > { %2977 = vmatmul.mubr.f32.vlgmr.msra.gmra.mrb[16].mxu1 %v2139_v4 }
 0xf37   : > { %v2229_v28 = vpop.f32.mrb[16].mxu1 }
 0xf38   : > { %v2230_v29 = vadd.f32 %v2728_v27, %v2229_v28  ;;  %v2978_v30 = vpop.f32.mrb[17].mxu1 }
 0xf3a   : > { %v2234_v32 = vmul.f32 0.044715, %v2230_v29  ;;  %v2233_v38 = vmul.f32 0.5, %v2230_v29 }
 0xf3c   : > { %v2235_v2 = vmul.f32 %v2234_v32, %v2230_v29 }
 0xf3e   : > { %v2236_v33 = vmul.f32 %v2235_v2, %v2230_v29 }
 0xf40   : > { %v2237_v34 = vadd.f32 %v2236_v33, %v2230_v29 }
 0xf42   : > { %v2238_v1 = vmul.f32 0.7978846, %v2237_v34 }
 0xf44   : > { %3364 = vtanh.f32 %v2238_v1 }
 0xf4e   : > { %v3365_v36 = vpop.eup %3364 }
 0xf4f   : > { %v2240_v7 = vadd.f32 1.0, %v3365_v36 }
 0xf51   : > { %v2241_v39 = vmul.f32 %v2240_v7, %v2233_v38 }
 0xf53   : > { %3012 = vmatmul.mubr.f32.vlgmr.msra.gmra.mrb[12].mxu0 %v2241_v39 }
0x1026   : > { %v2324_v40 = vpop.f32.mrb[12].mxu0 }
0x1027   : > { %v2328_v41 = vadd.f32 %v2324_v40, %v4866_v26  ;;  %v3013_v42 = vpop.f32.mrb[13].mxu0 }
0x1029   : > { %v2336_v43 = vadd.f32 %v2729_v37, %v2328_v41 }
0x102b   : > { %2337 = vst [vmem:[#allocation2] sm:$0xff] %v2336_v43  ;;  %2338 = vst [vmem:[%s887_s18] sm:$0xff] %v2336_v43 }
0x102c   : > { %3769 = shalt.err (!%p3766_p5)
}
0x102d   : > { %s3770_s18 = scalar_lea.hbm %s4933_s12, 128  ;;  %s3774_s26 = scalar_lea.hbm %s5156_s7, 512 }
0x102e   : > { %p3771_p7 = scmp.ne.s32.totalorder %s4933_s12, %s3770_s18  ;;  %p3775_p8 = scmp.lt.u32.totalorder %s4933_s12, %s5156_s7 }
0x102f   : > { %p3776_p12 = scmp.lt.u32.totalorder %s3774_s26, %s3770_s18  ;;  %p3778_p9 = scmp.lt.u32.totalorder %s3770_s18, %s4933_s12 }
0x1030   : > { %p3772_p13 = pnand %p3771_p7, %p5157_p0 }
0x1031   : > { %p3777_p2 = por %p3776_p12, %p3775_p8 }
0x1032   : > { %p3773_p6 = pneg %p3772_p13 }
0x1033   : > { %p3779_p10 = por %p3778_p9, %p3777_p2 }
0x1035   : > { %p3780_p4 = pnand %p3779_p10, %p3773_p6 }
0x1037   : > { %3783 = shalt.err (!%p3780_p4)
}
0x1038   : > { %3174 = dma.vmem_to_hbm [thread:$0]  (%p5157_p0), %s4935_s17, 128, %s4933_s12, %s2340_s16  }
0x1039 PF: > { %s5158_s24 = sld [smem:[#allocation33_spill]]  ;;  %p3221_p1 = scmp.ge.s32.totalorder %s3926_s21, 2 }
0x103a   : > { %p5159_p3 = scmp.ne.s32.totalorder %s5116_s0, 0 }
0x103c   : > { %p3217_p11 = pnand %p3221_p1, %p5159_p3 }
0x103f   : > { %s2367_s20 = sand.u32 1, %s5158_s24  }
0x1040   : > { %s2368_s14 = scalar_lea.sflag [#allocation5], %s2367_s20 }
0x1041   : > { %3869 = dma.done.wait (!%p3217_p11), %s2368_s14, 128  }
0x1042   : > { %3871 = vsyncadd (!%p3217_p11), %s2368_s14, 4294967168  ;;  %s47_s21 = sadd.s32 1, %s3926_s21   ;;  %s5161_s25 = sld [smem:[#allocation34_spill]] }
0x1043   : > { %p4967_p5 = scmp.ge.s32.totalorder %s47_s21, 6   ;;  %s5162_s26 = sld [smem:[#allocation35_spill]] }
0x1044   : > { %s5163_s27 = sld [smem:[#allocation47_spill]]  ;;  %s5165_s29 = sld [smem:[#allocation37_spill]] }
0x1045   : > { %s5164_s28 = sld [smem:[#allocation36_spill]]  ;;  %s5166_s3 = sld [smem:[#allocation45_spill]] }
0x1046   : > { %s5167_s17 = sld [smem:[#allocation38_spill]]  ;;  %s5168_s16 = sld [smem:[#allocation46_spill]] }
0x1047   : > { %s5169_s18 = sld [smem:[#allocation41_spill]]  ;;  %s5170_s0 = sld [smem:[#allocation43_spill]] }
0x1048   : > { %s5171_s20 = sld [smem:[#allocation44_spill]]  ;;  %s5174_s14 = smov %s3902_s15 }
0x1049   :  { %46 = sbr.rel (!%p4967_p5) target bundleno = 37 (0x25), region = 265 }
0x104b   : > { %s5173_s30 = smov %s5166_s3 }
0x104c   : > { %s5175_s15 = smov %s5167_s17  ;;  %s5176_s17 = smov %s3918_s19 }
0x104d   : > { %s5177_s19 = smov %s5170_s0 }
0x1050   :  { %2373 = vsyncpa [#allocation4], 1 }
0x1051   :  { %2375 = vsyncpa [#allocation4 + $0x1], 1 }
0x1052   :  { %2376 = vsyncpa [#allocation7], 1 }
0x1053   :  { %2378 = vsyncpa [#allocation7 + $0x1], 1 }
0x1054   :  { %2379 = vsyncpa [#allocation10], 1 }
0x1055   :  { %2381 = vsyncpa [#allocation10 + $0x1], 1 }
0x1056   :  { %2382 = vsyncpa [#allocation13], 1 }
0x1057   :  { %2384 = vsyncpa [#allocation13 + $0x1], 1 }
0x1058   :  { %2385 = vsyncpa [#allocation16], 1 }
0x1059   :  { %2387 = vsyncpa [#allocation16 + $0x1], 1 }
0x105a   :  { %2388 = vsyncpa [#allocation19], 1 }
0x105b   :  { %2390 = vsyncpa [#allocation19 + $0x1], 1 }
0x105c   :  { %2391 = vsyncpa [#allocation22], 1 }
0x105d   :  { %2393 = vsyncpa [#allocation22 + $0x1], 1 }
0x105e   :  { %2394 = vsyncpa [#allocation5], 1 }
0x105f   :  { %2396 = vsyncpa [#allocation5 + $0x1], 1 }

</bundles_post_ra>
